<compile_context>
chip_gen: v7x
topology: tpu7x:2x2x1
jax: 0.10.0
libtpu: 0.0.40
codegen_flags: <defaults>
</compile_context>

<pallas_src>
import math

import jax
import jax.numpy as jnp
from jax.experimental import pallas as pl
from jax.experimental.pallas import tpu as pltpu

# ------------------------- small synthetic config -------------------------
VOCAB = 50
PAD_ID = 1
MAX_POS = 40
TYPE_VOCAB = 1
HIDDEN = 32
NUM_HEADS = 2
HEAD_DIM = HIDDEN // NUM_HEADS
INTERMEDIATE = 64
NUM_LAYERS = 2
NUM_LABELS = 2
LN_EPS = 1e-5
SCALE = 1.0 / math.sqrt(HEAD_DIM)          # python float -> no captured constant

BATCH = 2
SEQ = 8


# ------------------------------ in-kernel helpers ------------------------------
def _gelu_tanh(x):
    # TODO(synk): HF 'gelu' is erf-exact; tanh approximation used (erf lowering is not
    # guaranteed in Mosaic).  Numerics differ by <1e-3 relative.
    c = math.sqrt(2.0 / math.pi)            # python float constant
    return 0.5 * x * (1.0 + jnp.tanh(c * (x + 0.044715 * x * x * x)))


def _layernorm(x, g, b, eps=LN_EPS):
    mu = jnp.mean(x, axis=-1, keepdims=True)
    var = jnp.mean((x - mu) ** 2, axis=-1, keepdims=True)
    return (x - mu) * jax.lax.rsqrt(var + eps) * g + b


# ------------------------------ fused encoder kernel ------------------------------
def encoder_layer_kernel(h0_ref, bias_ref, embg_ref, embb_ref,
                         wqkv_ref, bqkv_ref, wo_ref, bo_ref,
                         ln1g_ref, ln1b_ref, wi_ref, bi_ref,
                         wout_ref, bout_ref, ln2g_ref, ln2b_ref,
                         out_ref, carry_ref):
    layer = pl.program_id(0)

    # first grid step: residual-free embedding LayerNorm seeds the VMEM-resident carry
    @pl.when(layer == 0)
    def _():
        carry_ref[...] = _layernorm(h0_ref[...], embg_ref[...], embb_ref[...])

    h = carry_ref[...]                                          # [B*S, H]

    # ---- fused QKV projection: one matmul, 3x-wide N ----
    qkv = jnp.dot(h, wqkv_ref[0], preferred_element_type=jnp.float32) + bqkv_ref[0]
    q = qkv[:, 0 * HIDDEN:1 * HIDDEN]
    k = qkv[:, 1 * HIDDEN:2 * HIDDEN]
    v = qkv[:, 2 * HIDDEN:3 * HIDDEN]

    # ---- multi-head self-attention, fully VMEM-resident (statically unrolled B x heads) ----
    ctx_rows = []
    for b in range(BATCH):
        rows = slice(b * SEQ, (b + 1) * SEQ)
        bias_b = bias_ref[b:b + 1, :]                           # [1, S] additive key mask
        heads = []
        for hd in range(NUM_HEADS):
            cols = slice(hd * HEAD_DIM, (hd + 1) * HEAD_DIM)
            qb = q[rows, cols]                                  # [S, Dh]
            kb = k[rows, cols]
            vb = v[rows, cols]
            s = jax.lax.dot_general(qb, kb, (((1,), (1,)), ((), ())),
                                    preferred_element_type=jnp.float32) * SCALE
            s = s + bias_b
            s = s - jnp.max(s, axis=-1, keepdims=True)
            p = jnp.exp(s)
            p = p * pl.reciprocal(jnp.sum(p, axis=-1, keepdims=True), approx=True)
            heads.append(jnp.dot(p, vb, preferred_element_type=jnp.float32))
        ctx_rows.append(jnp.concatenate(heads, axis=1))         # [S, H]
    ctx = jnp.concatenate(ctx_rows, axis=0)                     # [B*S, H]

    # ---- attention output projection + residual + LayerNorm ----
    attn_out = jnp.dot(ctx, wo_ref[0], preferred_element_type=jnp.float32) + bo_ref[0]
    h1 = _layernorm(attn_out + h, ln1g_ref[0], ln1b_ref[0])

    # ---- feed-forward (GELU) + residual + LayerNorm ----
    inter = _gelu_tanh(jnp.dot(h1, wi_ref[0], preferred_element_type=jnp.float32)
                       + bi_ref[0])
    ffn = jnp.dot(inter, wout_ref[0], preferred_element_type=jnp.float32) + bout_ref[0]
    h2 = _layernorm(ffn + h1, ln2g_ref[0], ln2b_ref[0])

    carry_ref[...] = h2                                         # feeds the next layer

    @pl.when(layer == pl.num_programs(0) - 1)
    def _():
        out_ref[...] = h2


def encoder_stack(emb, attn_bias, p):
    """emb:[B*S,H] raw embedding sum; attn_bias:[B,S] additive mask. One pallas_call,
    grid over layers; hidden state stays resident in VMEM across all layers."""
    M = emb.shape[0]
    B, S = attn_bias.shape
    H, I = HIDDEN, INTERMEDIATE

    fixed2 = lambda l: (0, 0)
    perl3 = lambda l: (l, 0, 0)

    in_specs = [
        pl.BlockSpec((M, H), fixed2),            # emb (pre-LN)
        pl.BlockSpec((B, S), fixed2),            # attention bias
        pl.BlockSpec((1, H), fixed2),            # emb LN gamma
        pl.BlockSpec((1, H), fixed2),            # emb LN beta
        pl.BlockSpec((1, H, 3 * H), perl3),      # wqkv
        pl.BlockSpec((1, 1, 3 * H), perl3),      # bqkv
        pl.BlockSpec((1, H, H), perl3),          # wo
        pl.BlockSpec((1, 1, H), perl3),          # bo
        pl.BlockSpec((1, 1, H), perl3),          # ln1 gamma
        pl.BlockSpec((1, 1, H), perl3),          # ln1 beta
        pl.BlockSpec((1, H, I), perl3),          # wi
        pl.BlockSpec((1, 1, I), perl3),          # bi
        pl.BlockSpec((1, I, H), perl3),          # wout
        pl.BlockSpec((1, 1, H), perl3),          # bout
        pl.BlockSpec((1, 1, H), perl3),          # ln2 gamma
        pl.BlockSpec((1, 1, H), perl3),          # ln2 beta
    ]
    return pl.pallas_call(
        encoder_layer_kernel,
        out_shape=jax.ShapeDtypeStruct((M, H), jnp.float32),
        grid=(NUM_LAYERS,),
        in_specs=in_specs,
        out_specs=pl.BlockSpec((M, H), fixed2),
        scratch_shapes=[pltpu.VMEM((M, H), jnp.float32)],
        compiler_params=pltpu.CompilerParams(dimension_semantics=("arbitrary",)),
    )(emb, attn_bias,
      p["emb_ln_g"].reshape(1, H), p["emb_ln_b"].reshape(1, H),
      p["wqkv"], p["bqkv"], p["wo"], p["bo"], p["ln1_g"], p["ln1_b"],
      p["wi"], p["bi"], p["wout"], p["bout"], p["ln2_g"], p["ln2_b"])


# ------------------------------ fused classifier head ------------------------------
def classifier_kernel(x_ref, wd_ref, bd_ref, wo_ref, bo_ref, o_ref):
    x = x_ref[...]
    pooled = jnp.tanh(jnp.dot(x, wd_ref[...], preferred_element_type=jnp.float32)
                      + bd_ref[...])
    o_ref[...] = jnp.dot(pooled, wo_ref[...], preferred_element_type=jnp.float32) \
        + bo_ref[...]


def classifier_head(cls_tok, p):
    B = cls_tok.shape[0]
    return pl.pallas_call(
        classifier_kernel,
        out_shape=jax.ShapeDtypeStruct((B, NUM_LABELS), jnp.float32),
        in_specs=[pl.BlockSpec(memory_space=pltpu.MemorySpace.VMEM)] * 5,
        out_specs=pl.BlockSpec(memory_space=pltpu.MemorySpace.VMEM),
    )(cls_tok, p["cls_dense_w"], p["cls_dense_b"].reshape(1, HIDDEN),
      p["cls_out_w"], p["cls_out_b"].reshape(1, NUM_LABELS))


# ------------------------------ parameter init ------------------------------
def init_params(key):
    def normal(k, shape, std=0.02):
        return (std * jax.random.normal(k, shape)).astype(jnp.float32)

    keys = iter(jax.random.split(key, 64))
    L, H, I = NUM_LAYERS, HIDDEN, INTERMEDIATE
    return {
        "word_emb": normal(next(keys), (VOCAB, H)),
        "pos_emb": normal(next(keys), (MAX_POS, H)),
        "type_emb": normal(next(keys), (TYPE_VOCAB, H)),
        "emb_ln_g": jnp.ones((H,), jnp.float32),
        "emb_ln_b": jnp.zeros((H,), jnp.float32),
        # fused QKV projection (wq|wk|wv concatenated on the output axis), stacked over layers
        "wqkv": normal(next(keys), (L, H, 3 * H)),
        "bqkv": jnp.zeros((L, 1, 3 * H), jnp.float32),
        "wo": normal(next(keys), (L, H, H)),
        "bo": jnp.zeros((L, 1, H), jnp.float32),
        "ln1_g": jnp.ones((L, 1, H), jnp.float32),
        "ln1_b": jnp.zeros((L, 1, H), jnp.float32),
        "wi": normal(next(keys), (L, H, I)),
        "bi": jnp.zeros((L, 1, I), jnp.float32),
        "wout": normal(next(keys), (L, I, H)),
        "bout": jnp.zeros((L, 1, H), jnp.float32),
        "ln2_g": jnp.ones((L, 1, H), jnp.float32),
        "ln2_b": jnp.zeros((L, 1, H), jnp.float32),
        "cls_dense_w": normal(next(keys), (H, H)),
        "cls_dense_b": jnp.zeros((H,), jnp.float32),
        "cls_out_w": normal(next(keys), (H, NUM_LABELS)),
        "cls_out_b": jnp.zeros((NUM_LABELS,), jnp.float32),
    }


# ------------------------------ model forward ------------------------------
def xlm_roberta_forward(params, input_ids, lens, mask, labels):
    """Mirrors XLM_RoBERTa.forward: returns logits [B, NUM_LABELS]."""
    del lens, labels  # lens unused by the torch forward; loss not returned
    B, S = input_ids.shape

    # --- embeddings (glue: gathers in plain JAX) ---
    not_pad = (input_ids != PAD_ID).astype(jnp.int32)
    position_ids = jnp.cumsum(not_pad, axis=1) * not_pad + PAD_ID   # RoBERTa convention
    tok = jnp.take(params["word_emb"], input_ids, axis=0)           # [B,S,H]
    pos = jnp.take(params["pos_emb"], position_ids, axis=0)         # [B,S,H]
    typ = jnp.broadcast_to(params["type_emb"][0], (B, S, HIDDEN))   # token_type_ids = 0
    emb = (tok + pos + typ).reshape(B * S, HIDDEN).astype(jnp.float32)

    # additive attention bias from the padding mask
    attn_bias = (1.0 - mask.astype(jnp.float32)) * -1e9             # [B, S]

    # --- full encoder stack in one pallas_call (embedding LN folded into layer 0) ---
    h = encoder_stack(emb, attn_bias, params)                       # [B*S, H]

    # --- classification head: <s> (first) token -> dense -> tanh -> out_proj ---
    cls_tok = h.reshape(B, S, HIDDEN)[:, 0, :]                      # [B, H]
    logits = classifier_head(cls_tok, params)                       # [B, NUM_LABELS]
    return logits


# ----------------------------------- main -----------------------------------
if __name__ == "__main__":
    key = jax.random.PRNGKey(0)
    k_param, k_ids, k_lbl = jax.random.split(key, 3)

    params = init_params(k_param)

    # deterministic small inputs
    input_ids = jax.random.randint(k_ids, (BATCH, SEQ), 2, VOCAB, dtype=jnp.int32)
    lens = jnp.array([SEQ, SEQ - 2], dtype=jnp.int32)
    mask = (jnp.arange(SEQ)[None, :] < lens[:, None]).astype(jnp.int32)   # [B,S]
    input_ids = jnp.where(mask == 1, input_ids, PAD_ID)                   # pad tail
    labels = jax.random.randint(k_lbl, (BATCH,), 0, NUM_LABELS, dtype=jnp.int32)

    forward = jax.jit(xlm_roberta_forward)
    logits = forward(params, input_ids, lens, mask, labels)
    logits = jax.block_until_ready(logits)

    assert logits.shape == (BATCH, NUM_LABELS) and logits.dtype == jnp.float32
    assert bool(jnp.all(jnp.isfinite(logits)))
    print("KERNEL_OK")
</pallas_src>

<mosaic_0001>
module attributes {stable_mosaic.version = 11 : i64} {
  func.func @classifier_kernel(%arg0: memref<2x32xf32, #tpu.memory_space<vmem>>, %arg1: memref<32x32xf32, #tpu.memory_space<vmem>>, %arg2: memref<1x32xf32, #tpu.memory_space<vmem>>, %arg3: memref<32x2xf32, #tpu.memory_space<vmem>>, %arg4: memref<1x2xf32, #tpu.memory_space<vmem>>, %arg5: memref<2x2xf32, #tpu.memory_space<vmem>>) attributes {dimension_semantics = [], scalar_prefetch = 0 : i64, scratch_operands = 0 : i64, tpu.core_type = #tpu.core_type<tc>} {
    %c0 = arith.constant 0 : index
    %c0_0 = arith.constant 0 : index
    %0 = vector.load %arg0[%c0, %c0_0] : memref<2x32xf32, #tpu.memory_space<vmem>>, vector<2x32xf32>
    %c0_1 = arith.constant 0 : index
    %c0_2 = arith.constant 0 : index
    %1 = vector.load %arg1[%c0_1, %c0_2] : memref<32x32xf32, #tpu.memory_space<vmem>>, vector<32x32xf32>
    %cst = arith.constant dense<0.000000e+00> : vector<2x32xf32>
    %2 = tpu.matmul %0, %1, %cst {dimension_numbers = #tpu.dot_dimension_numbers<[1], [0], [0], [1], [0, 0, 1, 1], [], []>} : vector<2x32xf32>, vector<32x32xf32>, vector<2x32xf32> -> vector<2x32xf32>
    %c0_3 = arith.constant 0 : index
    %c0_4 = arith.constant 0 : index
    %3 = vector.load %arg2[%c0_3, %c0_4] : memref<1x32xf32, #tpu.memory_space<vmem>>, vector<1x32xf32>
    %4 = vector.broadcast %3 : vector<1x32xf32> to vector<2x32xf32>
    %5 = arith.addf %2, %4 : vector<2x32xf32>
    %6 = math.tanh %5 : vector<2x32xf32>
    %c0_5 = arith.constant 0 : index
    %c0_6 = arith.constant 0 : index
    %7 = vector.load %arg3[%c0_5, %c0_6] : memref<32x2xf32, #tpu.memory_space<vmem>>, vector<32x2xf32>
    %cst_7 = arith.constant dense<0.000000e+00> : vector<2x2xf32>
    %8 = tpu.matmul %6, %7, %cst_7 {dimension_numbers = #tpu.dot_dimension_numbers<[1], [0], [0], [1], [0, 0, 1, 1], [], []>} : vector<2x32xf32>, vector<32x2xf32>, vector<2x2xf32> -> vector<2x2xf32>
    %c0_8 = arith.constant 0 : index
    %c0_9 = arith.constant 0 : index
    %9 = vector.load %arg4[%c0_8, %c0_9] : memref<1x2xf32, #tpu.memory_space<vmem>>, vector<1x2xf32>
    %10 = vector.broadcast %9 : vector<1x2xf32> to vector<2x2xf32>
    %11 = arith.addf %8, %10 : vector<2x2xf32>
    %c0_10 = arith.constant 0 : index
    %c0_11 = arith.constant 0 : index
    %12 = vector.load %arg5[%c0_10, %c0_11] : memref<2x2xf32, #tpu.memory_space<vmem>>, vector<2x2xf32>
    tpu.vector_store %arg5[%c0_10, %c0_11], %11 {strides = array<i32>} : memref<2x2xf32, #tpu.memory_space<vmem>>, vector<2x2xf32>,
    return
  }
}

module attributes {stable_mosaic.version = 11 : i64} {
  func.func @encoder_layer_kernel(%arg0: i32, %arg1: memref<16x32xf32, #tpu.memory_space<vmem>>, %arg2: memref<2x8xf32, #tpu.memory_space<vmem>>, %arg3: memref<1x32xf32, #tpu.memory_space<vmem>>, %arg4: memref<1x32xf32, #tpu.memory_space<vmem>>, %arg5: memref<1x32x96xf32, #tpu.memory_space<vmem>>, %arg6: memref<1x1x96xf32, #tpu.memory_space<vmem>>, %arg7: memref<1x32x32xf32, #tpu.memory_space<vmem>>, %arg8: memref<1x1x32xf32, #tpu.memory_space<vmem>>, %arg9: memref<1x1x32xf32, #tpu.memory_space<vmem>>, %arg10: memref<1x1x32xf32, #tpu.memory_space<vmem>>, %arg11: memref<1x32x64xf32, #tpu.memory_space<vmem>>, %arg12: memref<1x1x64xf32, #tpu.memory_space<vmem>>, %arg13: memref<1x64x32xf32, #tpu.memory_space<vmem>>, %arg14: memref<1x1x32xf32, #tpu.memory_space<vmem>>, %arg15: memref<1x1x32xf32, #tpu.memory_space<vmem>>, %arg16: memref<1x1x32xf32, #tpu.memory_space<vmem>>, %arg17: memref<16x32xf32, #tpu.memory_space<vmem>>, %arg18: memref<16x32xf32, #tpu.memory_space<vmem>>) attributes {dimension_semantics = [#tpu.dimension_semantics<arbitrary>], iteration_bounds = array<i64: 2>, scalar_prefetch = 0 : i64, scratch_operands = 1 : i64, tpu.core_type = #tpu.core_type<tc>, window_params = [{pipeline_mode = #tpu.pipeline_mode<synchronous>, transform_indices = @transform_0, window_bounds = array<i64: 16, 32>}, {pipeline_mode = #tpu.pipeline_mode<synchronous>, transform_indices = @transform_1, window_bounds = array<i64: 2, 8>}, {pipeline_mode = #tpu.pipeline_mode<synchronous>, transform_indices = @transform_2, window_bounds = array<i64: 1, 32>}, {pipeline_mode = #tpu.pipeline_mode<synchronous>, transform_indices = @transform_3, window_bounds = array<i64: 1, 32>}, {transform_indices = @transform_4, window_bounds = array<i64: 1, 32, 96>}, {transform_indices = @transform_5, window_bounds = array<i64: 1, 1, 96>}, {transform_indices = @transform_6, window_bounds = array<i64: 1, 32, 32>}, {transform_indices = @transform_7, window_bounds = array<i64: 1, 1, 32>}, {transform_indices = @transform_8, window_bounds = array<i64: 1, 1, 32>}, {transform_indices = @transform_9, window_bounds = array<i64: 1, 1, 32>}, {transform_indices = @transform_10, window_bounds = array<i64: 1, 32, 64>}, {transform_indices = @transform_11, window_bounds = array<i64: 1, 1, 64>}, {transform_indices = @transform_12, window_bounds = array<i64: 1, 64, 32>}, {transform_indices = @transform_13, window_bounds = array<i64: 1, 1, 32>}, {transform_indices = @transform_14, window_bounds = array<i64: 1, 1, 32>}, {transform_indices = @transform_15, window_bounds = array<i64: 1, 1, 32>}, {pipeline_mode = #tpu.pipeline_mode<synchronous>, transform_indices = @transform_16, window_bounds = array<i64: 16, 32>}]} {
    %c0_i32 = arith.constant 0 : i32
    %0 = arith.cmpi eq, %arg0, %c0_i32 : i32
    %1 = arith.extui %0 : i1 to i32
    %c0_i32_0 = arith.constant 0 : i32
    %2 = arith.cmpi ne, %1, %c0_i32_0 : i32
    scf.if %2 {
      %c0_81 = arith.constant 0 : index
      %c0_82 = arith.constant 0 : index
      %187 = vector.load %arg1[%c0_81, %c0_82] : memref<16x32xf32, #tpu.memory_space<vmem>>, vector<16x32xf32>
      %c0_83 = arith.constant 0 : index
      %c0_84 = arith.constant 0 : index
      %188 = vector.load %arg3[%c0_83, %c0_84] : memref<1x32xf32, #tpu.memory_space<vmem>>, vector<1x32xf32>
      %c0_85 = arith.constant 0 : index
      %c0_86 = arith.constant 0 : index
      %189 = vector.load %arg4[%c0_85, %c0_86] : memref<1x32xf32, #tpu.memory_space<vmem>>, vector<1x32xf32>
      %cst_87 = arith.constant dense<0.000000e+00> : vector<16xf32>
      %190 = vector.multi_reduction <add>, %187, %cst_87 [1] : vector<16x32xf32> to vector<16xf32>
      %191 = vector.shape_cast %190 : vector<16xf32> to vector<16x1xf32>
      %cst_88 = arith.constant 3.200000e+01 : f32
      %192 = vector.broadcast %cst_88 : f32 to vector<16x1xf32>
      %193 = arith.divf %191, %192 : vector<16x1xf32>
      %194 = vector.broadcast %193 : vector<16x1xf32> to vector<16x32xf32>
      %195 = arith.subf %187, %194 : vector<16x32xf32>
      %196 = arith.mulf %195, %195 : vector<16x32xf32>
      %cst_89 = arith.constant dense<0.000000e+00> : vector<16xf32>
      %197 = vector.multi_reduction <add>, %196, %cst_89 [1] : vector<16x32xf32> to vector<16xf32>
      %198 = vector.shape_cast %197 : vector<16xf32> to vector<16x1xf32>
      %cst_90 = arith.constant 3.200000e+01 : f32
      %199 = vector.broadcast %cst_90 : f32 to vector<16x1xf32>
      %200 = arith.divf %198, %199 : vector<16x1xf32>
      %201 = vector.broadcast %193 : vector<16x1xf32> to vector<16x32xf32>
      %202 = arith.subf %187, %201 : vector<16x32xf32>
      %cst_91 = arith.constant 9.99999974E-6 : f32
      %203 = vector.broadcast %cst_91 : f32 to vector<16x1xf32>
      %204 = arith.addf %200, %203 : vector<16x1xf32>
      %205 = math.rsqrt %204 : vector<16x1xf32>
      %206 = vector.broadcast %205 : vector<16x1xf32> to vector<16x32xf32>
      %207 = arith.mulf %202, %206 : vector<16x32xf32>
      %208 = vector.broadcast %188 : vector<1x32xf32> to vector<16x32xf32>
      %209 = arith.mulf %207, %208 : vector<16x32xf32>
      %210 = vector.broadcast %189 : vector<1x32xf32> to vector<16x32xf32>
      %211 = arith.addf %209, %210 : vector<16x32xf32>
      %c0_92 = arith.constant 0 : index
      %c0_93 = arith.constant 0 : index
      %212 = vector.load %arg18[%c0_92, %c0_93] : memref<16x32xf32, #tpu.memory_space<vmem>>, vector<16x32xf32>
      tpu.vector_store %arg18[%c0_92, %c0_93], %211 {strides = array<i32>} : memref<16x32xf32, #tpu.memory_space<vmem>>, vector<16x32xf32>,
    } else {
    }
    %c0 = arith.constant 0 : index
    %c0_1 = arith.constant 0 : index
    %3 = vector.load %arg18[%c0, %c0_1] : memref<16x32xf32, #tpu.memory_space<vmem>>, vector<16x32xf32>
    %c0_2 = arith.constant 0 : index
    %c0_3 = arith.constant 0 : index
    %c0_4 = arith.constant 0 : index
    %4 = vector.load %arg5[%c0_2, %c0_3, %c0_4] : memref<1x32x96xf32, #tpu.memory_space<vmem>>, vector<1x32x96xf32>
    %5 = vector.shape_cast %4 : vector<1x32x96xf32> to vector<32x96xf32>
    %cst = arith.constant dense<0.000000e+00> : vector<16x96xf32>
    %6 = tpu.matmul %3, %5, %cst {dimension_numbers = #tpu.dot_dimension_numbers<[1], [0], [0], [1], [0, 0, 1, 1], [], []>} : vector<16x32xf32>, vector<32x96xf32>, vector<16x96xf32> -> vector<16x96xf32>
    %c0_5 = arith.constant 0 : index
    %c0_6 = arith.constant 0 : index
    %c0_7 = arith.constant 0 : index
    %7 = vector.load %arg6[%c0_5, %c0_6, %c0_7] : memref<1x1x96xf32, #tpu.memory_space<vmem>>, vector<1x1x96xf32>
    %8 = vector.shape_cast %7 : vector<1x1x96xf32> to vector<1x96xf32>
    %9 = vector.broadcast %8 : vector<1x96xf32> to vector<16x96xf32>
    %10 = arith.addf %6, %9 : vector<16x96xf32>
    %11 = vector.extract_strided_slice %10 {offsets = [0, 0], sizes = [16, 32], strides = [1, 1]} : vector<16x96xf32> to vector<16x32xf32>
    %12 = vector.extract_strided_slice %10 {offsets = [0, 32], sizes = [16, 32], strides = [1, 1]} : vector<16x96xf32> to vector<16x32xf32>
    %13 = vector.extract_strided_slice %10 {offsets = [0, 64], sizes = [16, 32], strides = [1, 1]} : vector<16x96xf32> to vector<16x32xf32>
    %c0_8 = arith.constant 0 : index
    %c0_9 = arith.constant 0 : index
    %14 = vector.load %arg2[%c0_8, %c0_9] : memref<2x8xf32, #tpu.memory_space<vmem>>, vector<1x8xf32>
    %15 = vector.extract_strided_slice %11 {offsets = [0, 0], sizes = [8, 16], strides = [1, 1]} : vector<16x32xf32> to vector<8x16xf32>
    %16 = vector.extract_strided_slice %12 {offsets = [0, 0], sizes = [8, 16], strides = [1, 1]} : vector<16x32xf32> to vector<8x16xf32>
    %17 = vector.extract_strided_slice %13 {offsets = [0, 0], sizes = [8, 16], strides = [1, 1]} : vector<16x32xf32> to vector<8x16xf32>
    %cst_10 = arith.constant dense<0.000000e+00> : vector<8x8xf32>
    %18 = tpu.matmul %15, %16, %cst_10 {dimension_numbers = #tpu.dot_dimension_numbers<[1], [1], [0], [0], [0, 0, 1, 0], [], []>} : vector<8x16xf32>, vector<8x16xf32>, vector<8x8xf32> -> vector<8x8xf32>
    %cst_11 = arith.constant 2.500000e-01 : f32
    %19 = vector.broadcast %cst_11 : f32 to vector<8x8xf32>
    %20 = arith.mulf %18, %19 : vector<8x8xf32>
    %21 = vector.broadcast %14 : vector<1x8xf32> to vector<8x8xf32>
    %22 = arith.addf %20, %21 : vector<8x8xf32>
    %cst_12 = arith.constant dense<0xFF800000> : vector<8xf32>
    %23 = vector.multi_reduction <maximumf>, %22, %cst_12 [1] : vector<8x8xf32> to vector<8xf32>
    %24 = vector.shape_cast %23 : vector<8xf32> to vector<8x1xf32>
    %25 = vector.broadcast %24 : vector<8x1xf32> to vector<8x8xf32>
    %26 = arith.subf %22, %25 : vector<8x8xf32>
    %27 = math.exp %26 : vector<8x8xf32>
    %cst_13 = arith.constant dense<0.000000e+00> : vector<8xf32>
    %28 = vector.multi_reduction <add>, %27, %cst_13 [1] : vector<8x8xf32> to vector<8xf32>
    %29 = vector.shape_cast %28 : vector<8xf32> to vector<8x1xf32>
    %30 = tpu.reciprocal %29 {approx = true} : vector<8x1xf32> -> vector<8x1xf32>
    %31 = vector.broadcast %30 : vector<8x1xf32> to vector<8x8xf32>
    %32 = arith.mulf %27, %31 : vector<8x8xf32>
    %cst_14 = arith.constant dense<0.000000e+00> : vector<8x16xf32>
    %33 = tpu.matmul %32, %17, %cst_14 {dimension_numbers = #tpu.dot_dimension_numbers<[1], [0], [0], [1], [0, 0, 1, 1], [], []>} : vector<8x8xf32>, vector<8x16xf32>, vector<8x16xf32> -> vector<8x16xf32>
    %34 = vector.extract_strided_slice %11 {offsets = [0, 16], sizes = [8, 16], strides = [1, 1]} : vector<16x32xf32> to vector<8x16xf32>
    %35 = vector.extract_strided_slice %12 {offsets = [0, 16], sizes = [8, 16], strides = [1, 1]} : vector<16x32xf32> to vector<8x16xf32>
    %36 = vector.extract_strided_slice %13 {offsets = [0, 16], sizes = [8, 16], strides = [1, 1]} : vector<16x32xf32> to vector<8x16xf32>
    %cst_15 = arith.constant dense<0.000000e+00> : vector<8x8xf32>
    %37 = tpu.matmul %34, %35, %cst_15 {dimension_numbers = #tpu.dot_dimension_numbers<[1], [1], [0], [0], [0, 0, 1, 0], [], []>} : vector<8x16xf32>, vector<8x16xf32>, vector<8x8xf32> -> vector<8x8xf32>
    %cst_16 = arith.constant 2.500000e-01 : f32
    %38 = vector.broadcast %cst_16 : f32 to vector<8x8xf32>
    %39 = arith.mulf %37, %38 : vector<8x8xf32>
    %40 = vector.broadcast %14 : vector<1x8xf32> to vector<8x8xf32>
    %41 = arith.addf %39, %40 : vector<8x8xf32>
    %cst_17 = arith.constant dense<0xFF800000> : vector<8xf32>
    %42 = vector.multi_reduction <maximumf>, %41, %cst_17 [1] : vector<8x8xf32> to vector<8xf32>
    %43 = vector.shape_cast %42 : vector<8xf32> to vector<8x1xf32>
    %44 = vector.broadcast %43 : vector<8x1xf32> to vector<8x8xf32>
    %45 = arith.subf %41, %44 : vector<8x8xf32>
    %46 = math.exp %45 : vector<8x8xf32>
    %cst_18 = arith.constant dense<0.000000e+00> : vector<8xf32>
    %47 = vector.multi_reduction <add>, %46, %cst_18 [1] : vector<8x8xf32> to vector<8xf32>
    %48 = vector.shape_cast %47 : vector<8xf32> to vector<8x1xf32>
    %49 = tpu.reciprocal %48 {approx = true} : vector<8x1xf32> -> vector<8x1xf32>
    %50 = vector.broadcast %49 : vector<8x1xf32> to vector<8x8xf32>
    %51 = arith.mulf %46, %50 : vector<8x8xf32>
    %cst_19 = arith.constant dense<0.000000e+00> : vector<8x16xf32>
    %52 = tpu.matmul %51, %36, %cst_19 {dimension_numbers = #tpu.dot_dimension_numbers<[1], [0], [0], [1], [0, 0, 1, 1], [], []>} : vector<8x8xf32>, vector<8x16xf32>, vector<8x16xf32> -> vector<8x16xf32>
    %53 = tpu.concatenate %33, %52 in 1 : vector<8x16xf32>, vector<8x16xf32> -> vector<8x32xf32>
    %c1 = arith.constant 1 : index
    %c0_20 = arith.constant 0 : index
    %54 = vector.load %arg2[%c1, %c0_20] : memref<2x8xf32, #tpu.memory_space<vmem>>, vector<1x8xf32>
    %55 = vector.extract_strided_slice %11 {offsets = [8, 0], sizes = [8, 16], strides = [1, 1]} : vector<16x32xf32> to vector<8x16xf32>
    %56 = vector.extract_strided_slice %12 {offsets = [8, 0], sizes = [8, 16], strides = [1, 1]} : vector<16x32xf32> to vector<8x16xf32>
    %57 = vector.extract_strided_slice %13 {offsets = [8, 0], sizes = [8, 16], strides = [1, 1]} : vector<16x32xf32> to vector<8x16xf32>
    %cst_21 = arith.constant dense<0.000000e+00> : vector<8x8xf32>
    %58 = tpu.matmul %55, %56, %cst_21 {dimension_numbers = #tpu.dot_dimension_numbers<[1], [1], [0], [0], [0, 0, 1, 0], [], []>} : vector<8x16xf32>, vector<8x16xf32>, vector<8x8xf32> -> vector<8x8xf32>
    %cst_22 = arith.constant 2.500000e-01 : f32
    %59 = vector.broadcast %cst_22 : f32 to vector<8x8xf32>
    %60 = arith.mulf %58, %59 : vector<8x8xf32>
    %61 = vector.broadcast %54 : vector<1x8xf32> to vector<8x8xf32>
    %62 = arith.addf %60, %61 : vector<8x8xf32>
    %cst_23 = arith.constant dense<0xFF800000> : vector<8xf32>
    %63 = vector.multi_reduction <maximumf>, %62, %cst_23 [1] : vector<8x8xf32> to vector<8xf32>
    %64 = vector.shape_cast %63 : vector<8xf32> to vector<8x1xf32>
    %65 = vector.broadcast %64 : vector<8x1xf32> to vector<8x8xf32>
    %66 = arith.subf %62, %65 : vector<8x8xf32>
    %67 = math.exp %66 : vector<8x8xf32>
    %cst_24 = arith.constant dense<0.000000e+00> : vector<8xf32>
    %68 = vector.multi_reduction <add>, %67, %cst_24 [1] : vector<8x8xf32> to vector<8xf32>
    %69 = vector.shape_cast %68 : vector<8xf32> to vector<8x1xf32>
    %70 = tpu.reciprocal %69 {approx = true} : vector<8x1xf32> -> vector<8x1xf32>
    %71 = vector.broadcast %70 : vector<8x1xf32> to vector<8x8xf32>
    %72 = arith.mulf %67, %71 : vector<8x8xf32>
    %cst_25 = arith.constant dense<0.000000e+00> : vector<8x16xf32>
    %73 = tpu.matmul %72, %57, %cst_25 {dimension_numbers = #tpu.dot_dimension_numbers<[1], [0], [0], [1], [0, 0, 1, 1], [], []>} : vector<8x8xf32>, vector<8x16xf32>, vector<8x16xf32> -> vector<8x16xf32>
    %74 = vector.extract_strided_slice %11 {offsets = [8, 16], sizes = [8, 16], strides = [1, 1]} : vector<16x32xf32> to vector<8x16xf32>
    %75 = vector.extract_strided_slice %12 {offsets = [8, 16], sizes = [8, 16], strides = [1, 1]} : vector<16x32xf32> to vector<8x16xf32>
    %76 = vector.extract_strided_slice %13 {offsets = [8, 16], sizes = [8, 16], strides = [1, 1]} : vector<16x32xf32> to vector<8x16xf32>
    %cst_26 = arith.constant dense<0.000000e+00> : vector<8x8xf32>
    %77 = tpu.matmul %74, %75, %cst_26 {dimension_numbers = #tpu.dot_dimension_numbers<[1], [1], [0], [0], [0, 0, 1, 0], [], []>} : vector<8x16xf32>, vector<8x16xf32>, vector<8x8xf32> -> vector<8x8xf32>
    %cst_27 = arith.constant 2.500000e-01 : f32
    %78 = vector.broadcast %cst_27 : f32 to vector<8x8xf32>
    %79 = arith.mulf %77, %78 : vector<8x8xf32>
    %80 = vector.broadcast %54 : vector<1x8xf32> to vector<8x8xf32>
    %81 = arith.addf %79, %80 : vector<8x8xf32>
    %cst_28 = arith.constant dense<0xFF800000> : vector<8xf32>
    %82 = vector.multi_reduction <maximumf>, %81, %cst_28 [1] : vector<8x8xf32> to vector<8xf32>
    %83 = vector.shape_cast %82 : vector<8xf32> to vector<8x1xf32>
    %84 = vector.broadcast %83 : vector<8x1xf32> to vector<8x8xf32>
    %85 = arith.subf %81, %84 : vector<8x8xf32>
    %86 = math.exp %85 : vector<8x8xf32>
    %cst_29 = arith.constant dense<0.000000e+00> : vector<8xf32>
    %87 = vector.multi_reduction <add>, %86, %cst_29 [1] : vector<8x8xf32> to vector<8xf32>
    %88 = vector.shape_cast %87 : vector<8xf32> to vector<8x1xf32>
    %89 = tpu.reciprocal %88 {approx = true} : vector<8x1xf32> -> vector<8x1xf32>
    %90 = vector.broadcast %89 : vector<8x1xf32> to vector<8x8xf32>
    %91 = arith.mulf %86, %90 : vector<8x8xf32>
    %cst_30 = arith.constant dense<0.000000e+00> : vector<8x16xf32>
    %92 = tpu.matmul %91, %76, %cst_30 {dimension_numbers = #tpu.dot_dimension_numbers<[1], [0], [0], [1], [0, 0, 1, 1], [], []>} : vector<8x8xf32>, vector<8x16xf32>, vector<8x16xf32> -> vector<8x16xf32>
    %93 = tpu.concatenate %73, %92 in 1 : vector<8x16xf32>, vector<8x16xf32> -> vector<8x32xf32>
    %94 = tpu.concatenate %53, %93 in 0 : vector<8x32xf32>, vector<8x32xf32> -> vector<16x32xf32>
    %c0_31 = arith.constant 0 : index
    %c0_32 = arith.constant 0 : index
    %c0_33 = arith.constant 0 : index
    %95 = vector.load %arg7[%c0_31, %c0_32, %c0_33] : memref<1x32x32xf32, #tpu.memory_space<vmem>>, vector<1x32x32xf32>
    %96 = vector.shape_cast %95 : vector<1x32x32xf32> to vector<32x32xf32>
    %cst_34 = arith.constant dense<0.000000e+00> : vector<16x32xf32>
    %97 = tpu.matmul %94, %96, %cst_34 {dimension_numbers = #tpu.dot_dimension_numbers<[1], [0], [0], [1], [0, 0, 1, 1], [], []>} : vector<16x32xf32>, vector<32x32xf32>, vector<16x32xf32> -> vector<16x32xf32>
    %c0_35 = arith.constant 0 : index
    %c0_36 = arith.constant 0 : index
    %c0_37 = arith.constant 0 : index
    %98 = vector.load %arg8[%c0_35, %c0_36, %c0_37] : memref<1x1x32xf32, #tpu.memory_space<vmem>>, vector<1x1x32xf32>
    %99 = vector.shape_cast %98 : vector<1x1x32xf32> to vector<1x32xf32>
    %100 = vector.broadcast %99 : vector<1x32xf32> to vector<16x32xf32>
    %101 = arith.addf %97, %100 : vector<16x32xf32>
    %102 = arith.addf %101, %3 : vector<16x32xf32>
    %c0_38 = arith.constant 0 : index
    %c0_39 = arith.constant 0 : index
    %c0_40 = arith.constant 0 : index
    %103 = vector.load %arg9[%c0_38, %c0_39, %c0_40] : memref<1x1x32xf32, #tpu.memory_space<vmem>>, vector<1x1x32xf32>
    %104 = vector.shape_cast %103 : vector<1x1x32xf32> to vector<1x32xf32>
    %c0_41 = arith.constant 0 : index
    %c0_42 = arith.constant 0 : index
    %c0_43 = arith.constant 0 : index
    %105 = vector.load %arg10[%c0_41, %c0_42, %c0_43] : memref<1x1x32xf32, #tpu.memory_space<vmem>>, vector<1x1x32xf32>
    %106 = vector.shape_cast %105 : vector<1x1x32xf32> to vector<1x32xf32>
    %cst_44 = arith.constant dense<0.000000e+00> : vector<16xf32>
    %107 = vector.multi_reduction <add>, %102, %cst_44 [1] : vector<16x32xf32> to vector<16xf32>
    %108 = vector.shape_cast %107 : vector<16xf32> to vector<16x1xf32>
    %cst_45 = arith.constant 3.200000e+01 : f32
    %109 = vector.broadcast %cst_45 : f32 to vector<16x1xf32>
    %110 = arith.divf %108, %109 : vector<16x1xf32>
    %111 = vector.broadcast %110 : vector<16x1xf32> to vector<16x32xf32>
    %112 = arith.subf %102, %111 : vector<16x32xf32>
    %113 = arith.mulf %112, %112 : vector<16x32xf32>
    %cst_46 = arith.constant dense<0.000000e+00> : vector<16xf32>
    %114 = vector.multi_reduction <add>, %113, %cst_46 [1] : vector<16x32xf32> to vector<16xf32>
    %115 = vector.shape_cast %114 : vector<16xf32> to vector<16x1xf32>
    %cst_47 = arith.constant 3.200000e+01 : f32
    %116 = vector.broadcast %cst_47 : f32 to vector<16x1xf32>
    %117 = arith.divf %115, %116 : vector<16x1xf32>
    %118 = vector.broadcast %110 : vector<16x1xf32> to vector<16x32xf32>
    %119 = arith.subf %102, %118 : vector<16x32xf32>
    %cst_48 = arith.constant 9.99999974E-6 : f32
    %120 = vector.broadcast %cst_48 : f32 to vector<16x1xf32>
    %121 = arith.addf %117, %120 : vector<16x1xf32>
    %122 = math.rsqrt %121 : vector<16x1xf32>
    %123 = vector.broadcast %122 : vector<16x1xf32> to vector<16x32xf32>
    %124 = arith.mulf %119, %123 : vector<16x32xf32>
    %125 = vector.broadcast %104 : vector<1x32xf32> to vector<16x32xf32>
    %126 = arith.mulf %124, %125 : vector<16x32xf32>
    %127 = vector.broadcast %106 : vector<1x32xf32> to vector<16x32xf32>
    %128 = arith.addf %126, %127 : vector<16x32xf32>
    %c0_49 = arith.constant 0 : index
    %c0_50 = arith.constant 0 : index
    %c0_51 = arith.constant 0 : index
    %129 = vector.load %arg11[%c0_49, %c0_50, %c0_51] : memref<1x32x64xf32, #tpu.memory_space<vmem>>, vector<1x32x64xf32>
    %130 = vector.shape_cast %129 : vector<1x32x64xf32> to vector<32x64xf32>
    %cst_52 = arith.constant dense<0.000000e+00> : vector<16x64xf32>
    %131 = tpu.matmul %128, %130, %cst_52 {dimension_numbers = #tpu.dot_dimension_numbers<[1], [0], [0], [1], [0, 0, 1, 1], [], []>} : vector<16x32xf32>, vector<32x64xf32>, vector<16x64xf32> -> vector<16x64xf32>
    %c0_53 = arith.constant 0 : index
    %c0_54 = arith.constant 0 : index
    %c0_55 = arith.constant 0 : index
    %132 = vector.load %arg12[%c0_53, %c0_54, %c0_55] : memref<1x1x64xf32, #tpu.memory_space<vmem>>, vector<1x1x64xf32>
    %133 = vector.shape_cast %132 : vector<1x1x64xf32> to vector<1x64xf32>
    %134 = vector.broadcast %133 : vector<1x64xf32> to vector<16x64xf32>
    %135 = arith.addf %131, %134 : vector<16x64xf32>
    %cst_56 = arith.constant 5.000000e-01 : f32
    %136 = vector.broadcast %cst_56 : f32 to vector<16x64xf32>
    %137 = arith.mulf %136, %135 : vector<16x64xf32>
    %cst_57 = arith.constant 4.471500e-02 : f32
    %138 = vector.broadcast %cst_57 : f32 to vector<16x64xf32>
    %139 = arith.mulf %138, %135 : vector<16x64xf32>
    %140 = arith.mulf %139, %135 : vector<16x64xf32>
    %141 = arith.mulf %140, %135 : vector<16x64xf32>
    %142 = arith.addf %135, %141 : vector<16x64xf32>
    %cst_58 = arith.constant 0.797884583 : f32
    %143 = vector.broadcast %cst_58 : f32 to vector<16x64xf32>
    %144 = arith.mulf %143, %142 : vector<16x64xf32>
    %145 = math.tanh %144 : vector<16x64xf32>
    %cst_59 = arith.constant 1.000000e+00 : f32
    %146 = vector.broadcast %cst_59 : f32 to vector<16x64xf32>
    %147 = arith.addf %146, %145 : vector<16x64xf32>
    %148 = arith.mulf %137, %147 : vector<16x64xf32>
    %c0_60 = arith.constant 0 : index
    %c0_61 = arith.constant 0 : index
    %c0_62 = arith.constant 0 : index
    %149 = vector.load %arg13[%c0_60, %c0_61, %c0_62] : memref<1x64x32xf32, #tpu.memory_space<vmem>>, vector<1x64x32xf32>
    %150 = vector.shape_cast %149 : vector<1x64x32xf32> to vector<64x32xf32>
    %cst_63 = arith.constant dense<0.000000e+00> : vector<16x32xf32>
    %151 = tpu.matmul %148, %150, %cst_63 {dimension_numbers = #tpu.dot_dimension_numbers<[1], [0], [0], [1], [0, 0, 1, 1], [], []>} : vector<16x64xf32>, vector<64x32xf32>, vector<16x32xf32> -> vector<16x32xf32>
    %c0_64 = arith.constant 0 : index
    %c0_65 = arith.constant 0 : index
    %c0_66 = arith.constant 0 : index
    %152 = vector.load %arg14[%c0_64, %c0_65, %c0_66] : memref<1x1x32xf32, #tpu.memory_space<vmem>>, vector<1x1x32xf32>
    %153 = vector.shape_cast %152 : vector<1x1x32xf32> to vector<1x32xf32>
    %154 = vector.broadcast %153 : vector<1x32xf32> to vector<16x32xf32>
    %155 = arith.addf %151, %154 : vector<16x32xf32>
    %156 = arith.addf %155, %128 : vector<16x32xf32>
    %c0_67 = arith.constant 0 : index
    %c0_68 = arith.constant 0 : index
    %c0_69 = arith.constant 0 : index
    %157 = vector.load %arg15[%c0_67, %c0_68, %c0_69] : memref<1x1x32xf32, #tpu.memory_space<vmem>>, vector<1x1x32xf32>
    %158 = vector.shape_cast %157 : vector<1x1x32xf32> to vector<1x32xf32>
    %c0_70 = arith.constant 0 : index
    %c0_71 = arith.constant 0 : index
    %c0_72 = arith.constant 0 : index
    %159 = vector.load %arg16[%c0_70, %c0_71, %c0_72] : memref<1x1x32xf32, #tpu.memory_space<vmem>>, vector<1x1x32xf32>
    %160 = vector.shape_cast %159 : vector<1x1x32xf32> to vector<1x32xf32>
    %cst_73 = arith.constant dense<0.000000e+00> : vector<16xf32>
    %161 = vector.multi_reduction <add>, %156, %cst_73 [1] : vector<16x32xf32> to vector<16xf32>
    %162 = vector.shape_cast %161 : vector<16xf32> to vector<16x1xf32>
    %cst_74 = arith.constant 3.200000e+01 : f32
    %163 = vector.broadcast %cst_74 : f32 to vector<16x1xf32>
    %164 = arith.divf %162, %163 : vector<16x1xf32>
    %165 = vector.broadcast %164 : vector<16x1xf32> to vector<16x32xf32>
    %166 = arith.subf %156, %165 : vector<16x32xf32>
    %167 = arith.mulf %166, %166 : vector<16x32xf32>
    %cst_75 = arith.constant dense<0.000000e+00> : vector<16xf32>
    %168 = vector.multi_reduction <add>, %167, %cst_75 [1] : vector<16x32xf32> to vector<16xf32>
    %169 = vector.shape_cast %168 : vector<16xf32> to vector<16x1xf32>
    %cst_76 = arith.constant 3.200000e+01 : f32
    %170 = vector.broadcast %cst_76 : f32 to vector<16x1xf32>
    %171 = arith.divf %169, %170 : vector<16x1xf32>
    %172 = vector.broadcast %164 : vector<16x1xf32> to vector<16x32xf32>
    %173 = arith.subf %156, %172 : vector<16x32xf32>
    %cst_77 = arith.constant 9.99999974E-6 : f32
    %174 = vector.broadcast %cst_77 : f32 to vector<16x1xf32>
    %175 = arith.addf %171, %174 : vector<16x1xf32>
    %176 = math.rsqrt %175 : vector<16x1xf32>
    %177 = vector.broadcast %176 : vector<16x1xf32> to vector<16x32xf32>
    %178 = arith.mulf %173, %177 : vector<16x32xf32>
    %179 = vector.broadcast %158 : vector<1x32xf32> to vector<16x32xf32>
    %180 = arith.mulf %178, %179 : vector<16x32xf32>
    %181 = vector.broadcast %160 : vector<1x32xf32> to vector<16x32xf32>
    %182 = arith.addf %180, %181 : vector<16x32xf32>
    %c0_78 = arith.constant 0 : index
    %c0_79 = arith.constant 0 : index
    %183 = vector.load %arg18[%c0_78, %c0_79] : memref<16x32xf32, #tpu.memory_space<vmem>>, vector<16x32xf32>
    tpu.vector_store %arg18[%c0_78, %c0_79], %182 {strides = array<i32>} : memref<16x32xf32, #tpu.memory_space<vmem>>, vector<16x32xf32>,
    %c1_i32 = arith.constant 1 : i32
    %184 = arith.cmpi eq, %arg0, %c1_i32 : i32
    %185 = arith.extui %184 : i1 to i32
    %c0_i32_80 = arith.constant 0 : i32
    %186 = arith.cmpi ne, %185, %c0_i32_80 : i32
    scf.if %186 {
      %c0_81 = arith.constant 0 : index
      %c0_82 = arith.constant 0 : index
      %187 = vector.load %arg17[%c0_81, %c0_82] : memref<16x32xf32, #tpu.memory_space<vmem>>, vector<16x32xf32>
      tpu.vector_store %arg17[%c0_81, %c0_82], %182 {strides = array<i32>} : memref<16x32xf32, #tpu.memory_space<vmem>>, vector<16x32xf32>,
    } else {
    }
    return
  }
  func.func @transform_0(%arg0: i32) -> (i32, i32) {
    %c0_i32 = arith.constant 0 : i32
    %c0_i32_0 = arith.constant 0 : i32
    %c0_i32_1 = arith.constant 0 : i32
    return %c0_i32, %c0_i32_0 : i32, i32
  }
  func.func @transform_1(%arg0: i32) -> (i32, i32) {
    %c0_i32 = arith.constant 0 : i32
    %c0_i32_0 = arith.constant 0 : i32
    %c0_i32_1 = arith.constant 0 : i32
    return %c0_i32, %c0_i32_0 : i32, i32
  }
  func.func @transform_2(%arg0: i32) -> (i32, i32) {
    %c0_i32 = arith.constant 0 : i32
    %c0_i32_0 = arith.constant 0 : i32
    %c0_i32_1 = arith.constant 0 : i32
    return %c0_i32, %c0_i32_0 : i32, i32
  }
  func.func @transform_3(%arg0: i32) -> (i32, i32) {
    %c0_i32 = arith.constant 0 : i32
    %c0_i32_0 = arith.constant 0 : i32
    %c0_i32_1 = arith.constant 0 : i32
    return %c0_i32, %c0_i32_0 : i32, i32
  }
  func.func @transform_4(%arg0: i32) -> (i32, i32, i32) {
    %c0_i32 = arith.constant 0 : i32
    %c0_i32_0 = arith.constant 0 : i32
    %c0_i32_1 = arith.constant 0 : i32
    return %arg0, %c0_i32, %c0_i32_0 : i32, i32, i32
  }
  func.func @transform_5(%arg0: i32) -> (i32, i32, i32) {
    %c0_i32 = arith.constant 0 : i32
    %c0_i32_0 = arith.constant 0 : i32
    %c0_i32_1 = arith.constant 0 : i32
    return %arg0, %c0_i32, %c0_i32_0 : i32, i32, i32
  }
  func.func @transform_6(%arg0: i32) -> (i32, i32, i32) {
    %c0_i32 = arith.constant 0 : i32
    %c0_i32_0 = arith.constant 0 : i32
    %c0_i32_1 = arith.constant 0 : i32
    return %arg0, %c0_i32, %c0_i32_0 : i32, i32, i32
  }
  func.func @transform_7(%arg0: i32) -> (i32, i32, i32) {
    %c0_i32 = arith.constant 0 : i32
    %c0_i32_0 = arith.constant 0 : i32
    %c0_i32_1 = arith.constant 0 : i32
    return %arg0, %c0_i32, %c0_i32_0 : i32, i32, i32
  }
  func.func @transform_8(%arg0: i32) -> (i32, i32, i32) {
    %c0_i32 = arith.constant 0 : i32
    %c0_i32_0 = arith.constant 0 : i32
    %c0_i32_1 = arith.constant 0 : i32
    return %arg0, %c0_i32, %c0_i32_0 : i32, i32, i32
  }
  func.func @transform_9(%arg0: i32) -> (i32, i32, i32) {
    %c0_i32 = arith.constant 0 : i32
    %c0_i32_0 = arith.constant 0 : i32
    %c0_i32_1 = arith.constant 0 : i32
    return %arg0, %c0_i32, %c0_i32_0 : i32, i32, i32
  }
  func.func @transform_10(%arg0: i32) -> (i32, i32, i32) {
    %c0_i32 = arith.constant 0 : i32
    %c0_i32_0 = arith.constant 0 : i32
    %c0_i32_1 = arith.constant 0 : i32
    return %arg0, %c0_i32, %c0_i32_0 : i32, i32, i32
  }
  func.func @transform_11(%arg0: i32) -> (i32, i32, i32) {
    %c0_i32 = arith.constant 0 : i32
    %c0_i32_0 = arith.constant 0 : i32
    %c0_i32_1 = arith.constant 0 : i32
    return %arg0, %c0_i32, %c0_i32_0 : i32, i32, i32
  }
  func.func @transform_12(%arg0: i32) -> (i32, i32, i32) {
    %c0_i32 = arith.constant 0 : i32
    %c0_i32_0 = arith.constant 0 : i32
    %c0_i32_1 = arith.constant 0 : i32
    return %arg0, %c0_i32, %c0_i32_0 : i32, i32, i32
  }
  func.func @transform_13(%arg0: i32) -> (i32, i32, i32) {
    %c0_i32 = arith.constant 0 : i32
    %c0_i32_0 = arith.constant 0 : i32
    %c0_i32_1 = arith.constant 0 : i32
    return %arg0, %c0_i32, %c0_i32_0 : i32, i32, i32
  }
  func.func @transform_14(%arg0: i32) -> (i32, i32, i32) {
    %c0_i32 = arith.constant 0 : i32
    %c0_i32_0 = arith.constant 0 : i32
    %c0_i32_1 = arith.constant 0 : i32
    return %arg0, %c0_i32, %c0_i32_0 : i32, i32, i32
  }
  func.func @transform_15(%arg0: i32) -> (i32, i32, i32) {
    %c0_i32 = arith.constant 0 : i32
    %c0_i32_0 = arith.constant 0 : i32
    %c0_i32_1 = arith.constant 0 : i32
    return %arg0, %c0_i32, %c0_i32_0 : i32, i32, i32
  }
  func.func @transform_16(%arg0: i32) -> (i32, i32) {
    %c0_i32 = arith.constant 0 : i32
    %c0_i32_0 = arith.constant 0 : i32
    %c0_i32_1 = arith.constant 0 : i32
    return %c0_i32, %c0_i32_0 : i32, i32
  }
}

</mosaic_0001>

<bundles_post_ra>
// kernel: xlm_roberta_forward.3
= control target key start
LH: loop header
LB: loop body
LE: loop exit
PB: predicated region body
PF: predicated region fallthrough
CT: control target
= control target key end

     0   :  { %v286_v3 = vmov 0.0|0.0   ;;  %vm287_vm0 = vmmov 0   ;;  %v288_v6 = vmov 0.0   ;;  %s367_s0 = inlined_call_operand.vmem [shape: f32[2,32], index: 0, kind: input, shape index: {}]   ;;  %s368_s1 = inlined_call_operand.vmem [shape: f32[32,32], index: 1, kind: input, shape index: {}]   ;;  %s369_s2 = inlined_call_operand.vmem [shape: f32[1,32], index: 2, kind: input, shape index: {}]   ;;  %s370_s3 = inlined_call_operand.vmem [shape: f32[32,2], index: 3, kind: input, shape index: {}]   ;;  %s371_s4 = inlined_call_operand.vmem [shape: f32[1,2], index: 4, kind: input, shape index: {}]   ;;  %s372_s5 = inlined_call_operand.hbm [shape: f32[2,2], index: 5, kind: output, shape index: {}]  }
   0x1   :  { %v22_v0 = vld [vmem:[%s368_s1] sm:$0xff]  ;;  %v23_v1 = vld [vmem:[%s368_s1 + $0x8] sm:$0xff]  ;;  %v24_v2 = vld [vmem:[%s368_s1 + $0x10] sm:$0xff]  ;;  %244 = vmatprep.subr.bf16.mxu0 %v286_v3  ;;  %230 = vmatprep.mubr.msk.f32.mxu0 %vm287_vm0, %v288_v6 }
   0x2   :  { %v245_v4 = vpack.c.bf16 %v23_v1, %v22_v0  ;;  %v25_v5 = vld [vmem:[%s368_s1 + $0x18] sm:$0xff]  ;;  %250 = vmatprep.subr.bf16.mxu1 %v286_v3  ;;  %241 = vmatprep.mubr.msk.f32.mxu1 %vm287_vm0, %v288_v6 }
   0x3   :  { %10 = vsyncpa [#allocation3], 0  ;;  %v248_v7 = vpack.c.bf16 %v25_v5, %v24_v2  ;;  %v21_v8 = vld [vmem:[%s367_s0] sm:$0x3]  ;;  %vm33_vm1 = vcmask 261120   ;;  %v109_v10 = vld [vmem:[%s370_s3 + $0x8] sm:$0xff] }
   0x4   :  { %246 = vmatpush3.bf16.msra.mxu0 %v245_v4  ;;  %v108_v9 = vld [vmem:[%s370_s3] sm:$0xff]  ;;  %v110_v11 = vld [vmem:[%s370_s3 + $0x10] sm:$0xff]  ;;  %v111_v13 = vld [vmem:[%s370_s3 + $0x18] sm:$0xff]  ;;  %s289_s3 = smov [#allocation2]   ;;  %vm192_vm2 = vcmask 9216  }
   0x5   :  { %247 = vmatprep.subr.bf16.mxu0 %v286_v3  ;;  %v251_v12 = vpack.c.bf16 %v109_v10, %v108_v9  ;;  %v254_v14 = vpack.c.bf16 %v111_v13, %v110_v11  ;;  %v208_v15 = vld [vmem:[%s369_s2] ss:$0 sm:$0xff]  ;;  %s200_s13 = sshll.u32 %s289_s3, 4  ;;  %s201_s13 = int_to_ptr.vmem [resolvable:$true] %s200_s13 }
   0x6   :  { %v210_v20 = vld [vmem:[%s371_s4] ss:$0 sm:$0xff]  ;;  %s262_s2 = scalar_lea.vmem %s201_s13, 32  ;;  %p267_p1 = scmp.lt.s32.totalorder %s201_s13, %s201_s13 }
   0x7   :  { %252 = vmatpush3.bf16.msra.mxu1 %v251_v12  ;;  %p263_p0 = scmp.ne.s32.totalorder %s201_s13, %s262_s2  ;;  %p268_p2 = scmp.lt.s32.totalorder %s262_s2, %s262_s2 }
   0x8   :  { %249 = vmatpush3.bf16.msra.mxu0 %v248_v7  ;;  %253 = vmatprep.subr.bf16.mxu1 %v286_v3 }
   0x9   :  { %p269_p3 = por %p268_p2, %p267_p1 }
   0xb   :  { %231 = vmatmul.mubr.msk.f32.vlgmr.msra.gmra.mrb[0].mxu0 %vm33_vm1, %v21_v8  ;;  %255 = vmatpush3.bf16.msra.mxu1 %v254_v14  ;;  %p270_p4 = pnand %p269_p3, %p263_p0 }
  0xde   :  { %v103_v16 = vpop.f32.mrb[0].mxu0 }
  0xdf   :  { %v104_v17 = vadd.f32 %v208_v15, %v103_v16  ;;  %v232_v18 = vpop.f32.mrb[1].mxu0 }
  0xe1   :  { %260 = vtanh.f32 %v104_v17 }
  0xeb   :  { %v261_v19 = vpop.eup %260 }
  0xec   :  { %242 = vmatmul.mubr.msk.f32.vlgmr.msra.gmra.mrb[0].mxu1 %vm33_vm1, %v261_v19 }
 0x1bf   :  { %v188_v21 = vpop.f32.mrb[0].mxu1 }
 0x1c0   :  { %v189_v22 = vadd.f32 %v210_v20, %v188_v21  ;;  %v243_v23 = vpop.f32.mrb[1].mxu1 }
 0x1c2   :  { %193 = vst.msk [vmem:[#allocation2] sm:$0x3] %vm192_vm2, %v189_v22 }
 0x1c3   :  { %273 = shalt.err (!%p270_p4)
}
 0x1c4   :  { %s274_s16 = scalar_lea.hbm %s372_s5, 32 }
 0x1c5   :  { %p275_p5 = scmp.ne.s32.totalorder %s372_s5, %s274_s16  ;;  %p278_p6 = scmp.lt.u32.totalorder %s274_s16, %s372_s5 }
 0x1c7   :  { %p280_p7 = pnand %p278_p6, %p275_p5 }
 0x1c9   :  { %283 = shalt.err (!%p280_p7)
}
 0x1ca   :  { %203 = dma.vmem_to_hbm [thread:$0]  %s201_s13, 32, %s372_s5, [#allocation3]  }
 0x1cb   :  { %284 = dma.done.wait [#allocation3], 32  }
 0x1cc   :  { %285 = vsyncadd [#allocation3], 4294967264 }
 0x1cd   :  { %207 = vsyncpa [#allocation3], 1 }

// kernel: xlm_roberta_forward.2
= control target key start
LH: loop header
LB: loop body
LE: loop exit
PB: predicated region body
PF: predicated region fallthrough
CT: control target
= control target key end

     0   :  { %s2429_s21 = smov 0   ;;  %s2682_s0 = inlined_call_operand.vmem [shape: f32[16,32], index: 0, kind: input, shape index: {}]   ;;  %s2683_s1 = inlined_call_operand.vmem [shape: f32[2,8], index: 1, kind: input, shape index: {}]   ;;  %s2684_s2 = inlined_call_operand.vmem [shape: f32[1,32], index: 2, kind: input, shape index: {}]   ;;  %s2685_s3 = inlined_call_operand.vmem [shape: f32[1,32], index: 3, kind: input, shape index: {}]   ;;  %s2686_s4 = inlined_call_operand.vmem [shape: f32[2,32,96], index: 4, kind: input, shape index: {}]   ;;  %s2687_s5 = inlined_call_operand.vmem [shape: f32[2,1,96], index: 5, kind: input, shape index: {}]   ;;  %s2688_s6 = inlined_call_operand.vmem [shape: f32[2,32,32], index: 6, kind: input, shape index: {}]   ;;  %s2689_s7 = inlined_call_operand.vmem [shape: f32[2,1,32], index: 7, kind: input, shape index: {}]   ;;  %s2690_s8 = inlined_call_operand.vmem [shape: f32[2,1,32], index: 8, kind: input, shape index: {}]   ;;  %s2691_s9 = inlined_call_operand.vmem [shape: f32[2,1,32], index: 9, kind: input, shape index: {}]   ;;  %s2692_s10 = inlined_call_operand.vmem [shape: f32[2,32,64], index: 10, kind: input, shape index: {}]   ;;  %s2693_s11 = inlined_call_operand.vmem [shape: f32[2,1,64], index: 11, kind: input, shape index: {}]   ;;  %s2694_s12 = inlined_call_operand.vmem [shape: f32[2,64,32], index: 12, kind: input, shape index: {}]   ;;  %s2695_s13 = inlined_call_operand.vmem [shape: f32[2,1,32], index: 13, kind: input, shape index: {}]   ;;  %s2696_s14 = inlined_call_operand.vmem [shape: f32[2,1,32], index: 14, kind: input, shape index: {}]   ;;  %s2697_s15 = inlined_call_operand.vmem [shape: f32[2,1,32], index: 15, kind: input, shape index: {}]   ;;  %s2698_s16 = inlined_call_operand.vmem [shape: f32[16,32], index: 16, kind: output, shape index: {}]  }
   0x1   :  { %2704 = sst [smem:[#allocation5_spill]] %s2682_s0 }
   0x2   :  { %2705 = sst [smem:[#allocation6_spill]] %s2683_s1 }
   0x3   :  { %2706 = sst [smem:[#allocation7_spill]] %s2685_s3 }
   0x4   :  { %2707 = sst [smem:[#allocation8_spill]] %s2686_s4 }
   0x5   :  { %2708 = sst [smem:[#allocation9_spill]] %s2688_s6 }
   0x6   :  { %2709 = sst [smem:[#allocation10_spill]] %s2698_s16 }
   0x7 LB: > { %2710 = sst [smem:[#allocation3_spill]] %s2334_s21  ;;  %s2435_s22 = sadd.s32 4294967295, %s2334_s21   ;;  %s2334_s21 = sphi %s2429_s21, %s26_s21  }
   0x8   : > { %p2055_p0 = scmp.ge.s32.totalorder %s2334_s21, 1  ;;  %p551_p1 = scmp.lt.s32.totalorder %s2334_s21, 3 }
   0xa   : > { %p552_p2 = pnand %p2055_p0, %p551_p1 }
   0xc   : > { %555 = sbr.rel (%p552_p2) target bundleno = 2867 (0xb33), region = 84 }
  0x13   : > { %p635_p3 = scmp.lt.s32.totalorder %s2435_s22, 1  ;;  %s2711_s4 = sld [smem:[#allocation8_spill]] }
  0x14   : > { %s2712_s6 = sld [smem:[#allocation9_spill]]  ;;  %p2064_p4 = scmp.ne.s32.totalorder %s2435_s22, 0 }
  0x15   : > { %s2441_s23 = scalar_select %p635_p3, %s2435_s22, 1 }
  0x16   : > { %682 = sbr.rel (%p2064_p4) target bundleno = 347 (0x15b), region = 88  ;;  %s2714_s19 = sld [smem:[#allocation5_spill]] (!%p2064_p4)  ;;  %vm687_vm0 = vcmask (!%p2064_p4), 261120   ;;  %v2065_v21 = vld [vmem:[%s2684_s2] ss:$0 sm:$0xff] (!%p2064_p4) }
  0x17   : > { %s2100_s24 = sshll.u32 %s2441_s23, 5  ;;  %s672_s25 = scalar_lea.vmem %s2695_s13, %s2441_s23 }
  0x18   : > { %s675_s28 = scalar_lea.vmem %s2696_s14, %s2441_s23  ;;  %s678_s3 = scalar_lea.vmem %s2697_s15, %s2441_s23 }
  0x19   : > { %s2451_s30 = scalar_lea.vmem %s2711_s4, %s2100_s24  ;;  %s2473_s4 = scalar_lea.vmem %s2692_s10, %s2100_s24 }
  0x1a   : > { %s2456_s18 = scalar_lea.vmem %s2712_s6, %s2100_s24  ;;  %s664_s6 = scalar_lea.vmem %s2693_s11, %s2441_s23 }
  0x1b   : > { %2713 = sst [smem:[#allocation4_spill]] %s2456_s18  ;;  %s2103_s18 = sshll.u32 %s2441_s23, 6 }
  0x1c   : > { %s2483_s21 = scalar_lea.vmem %s2694_s12, %s2103_s18  ;;  %v683_v0 = vld [vmem:[%s2714_s19] sm:$0xff] (!%p2064_p4)  ;;  %v684_v1 = vld [vmem:[%s2714_s19 + $0x8] sm:$0xff] (!%p2064_p4)  ;;  %s2715_s24 = sld [smem:[#allocation7_spill]] (!%p2064_p4) }
  0x1d   : > { %v688_v2 = vsel %vm687_vm0, %v683_v0, 0.0  ;;  %v691_v3 = vsel %vm687_vm0, %v684_v1, 0.0 }
  0x1e   : > { %689 = vadd.xlane.f32.xlu0 %v688_v2 }
  0x22   : > { %692 = vadd.xlane.f32.xlu0 %v691_v3  ;;  %v2066_v23 = vld [vmem:[%s2715_s24] ss:$0 sm:$0xff] }
  0xab   : > { %v690_v4 = vpop.xlane.xlu0 %689 }
  0xac   : > { %v695_v5 = vmul.f32 0.03125, %v690_v4 }
  0xae   : > { %v697_v6 = vsub.f32 %v683_v0, %v695_v5 }
  0xaf   : > { %v693_v7 = vpop.xlane.xlu0 %692 }
  0xb0   : > { %v696_v8 = vmul.f32 0.03125, %v693_v7  ;;  %v699_v9 = vmul.f32 %v697_v6, %v697_v6 }
  0xb2   : > { %v698_v10 = vsub.f32 %v684_v1, %v696_v8  ;;  %v701_v11 = vsel %vm687_vm0, %v699_v9, 0.0 }
  0xb3   : > { %702 = vadd.xlane.f32.xlu1 %v701_v11 }
  0xb4   : > { %v700_v12 = vmul.f32 %v698_v10, %v698_v10 }
  0xb6   : > { %v704_v13 = vsel %vm687_vm0, %v700_v12, 0.0 }
  0xb7   : > { %705 = vadd.xlane.f32.xlu1 %v704_v13 }
 0x140   : > { %v703_v14 = vpop.xlane.xlu1 %702 }
 0x141   : > { %v707_v15 = vmul.f32 0.03125, %v703_v14 }
 0x143   : > { %v709_v16 = vadd.f32 1e-05, %v707_v15 }
 0x144   : > { %v706_v17 = vpop.xlane.xlu1 %705 }
 0x145   : > { %2296 = vrsqrt.f32 %v709_v16  ;;  %v708_v18 = vmul.f32 0.03125, %v706_v17 }
 0x147   : > { %v710_v19 = vadd.f32 1e-05, %v708_v18 }
 0x149   : > { %2298 = vrsqrt.f32 %v710_v19 }
 0x14f   : > { %v2297_v20 = vpop.eup %2296 }
 0x150   : > { %v713_v22 = vmul.f32 %v2297_v20, %v697_v6 }
 0x152   : > { %v721_v24 = vmul.f32 %v2065_v21, %v713_v22 }
 0x153   : > { %v2299_v25 = vpop.eup %2298 }
 0x154   : > { %v729_v26 = vadd.f32 %v2066_v23, %v721_v24  ;;  %v714_v27 = vmul.f32 %v2299_v25, %v698_v10 }
 0x156   : > { %731 = vst.msk [vmem:[#allocation2] sm:$0xff] %vm687_vm0, %v729_v26  ;;  %v722_v28 = vmul.f32 %v2065_v21, %v714_v27 }
 0x158   : > { %v730_v29 = vadd.f32 %v2066_v23, %v722_v28 }
 0x15a   : > { %732 = vst.msk [vmem:[#allocation2 + $0x8] sm:$0xff] %vm687_vm0, %v730_v29 }
 0x15b PF: > { %v735_v30 = vld [vmem:[%s2451_s30] sm:$0xff]  ;;  %v736_v31 = vld [vmem:[%s2451_s30 + $0x8] sm:$0xff]  ;;  %v737_v32 = vld [vmem:[%s2451_s30 + $0x10] sm:$0xff]  ;;  %vm746_vm1 = vcmask 261120   ;;  %v2336_v38 = vmov 0.0   ;;  %vm2337_vm2 = vmmov 0   ;;  %s2716_s0 = scalar_lea.vmem %s2687_s5, %s2441_s23  ;;  %s2719_s27 = scalar_lea.vmem %s2689_s7, %s2441_s23 }
 0x15c   : > { %v2240_v33 = vpack.c.bf16 %v736_v31, %v735_v30  ;;  %v738_v34 = vld [vmem:[%s2451_s30 + $0x18] sm:$0xff]  ;;  %2169 = vmatprep.subr.mxu0 %v2336_v38  ;;  %2171 = vmatprep.mubr.msk.f32.mxu0 %vm2337_vm2, %v2336_v38  ;;  %v2067_v39 = vld [vmem:[%s2716_s0] ss:$0 sm:$0xff]  ;;  %s2338_s17 = smov 112   ;;  %s2339_s18 = smov 96   ;;  %vm832_vm3 = vcmask 130048  }
 0x15d   : > { %v2520_v35 = vld [vmem:[#allocation2] sm:$0xff]  ;;  %v2244_v36 = vpack.c.bf16 %v738_v34, %v737_v32  ;;  %s2340_s20 = smov 80   ;;  %s2717_s16 = sld [smem:[#allocation6_spill]]  ;;  %vm913_vm4 = vcmask 64512   ;;  %vm1780_vm5 = vcmask 523264  }
 0x15e   : > { %2156 = vmatprep.mubr.msk.f32.mxu1 %vm746_vm1, %v2520_v35  ;;  %2241 = vmatprep.subr.bf16.mxu1 %v2240_v33  ;;  %s2341_s30 = smov 64   ;;  %s2342_s29 = smov 48  }
 0x15f   : > { %2243 = vmatpush3.bf16.msra.mxu1 %v2240_v33  ;;  %s2718_s0 = sld [smem:[#allocation4_spill]]  ;;  %s2720_s24 = scalar_lea.vmem %s2690_s8, %s2441_s23 }
 0x160   : > { %2245 = vmatprep.subr.bf16.mxu1 %v2244_v36  ;;  %p2097_p5 = scmp.ne.s32.totalorder %s2435_s22, 1 }
 0x161   : > { %v2524_v37 = vld [vmem:[#allocation2 + $0x8] sm:$0xff]  ;;  %s2722_s26 = sld [smem:[#allocation10_spill]] (!%p2097_p5) }
 0x163   : > { %2247 = vmatpush3.bf16.msra.mxu1 %v2244_v36  ;;  %v2072_v51 = vld [vmem:[%s2717_s16] ss:$0 sm:$0xff]  ;;  %v2079_v61 = vld [vmem:[%s2717_s16 + $0x1] ss:$0 sm:$0xff] }
 0x164   : > { %2159 = vmatprep.subr.mxu1 %v2336_v38 }
 0x166   : > { %2157 = vmatmul.mubr.msk.f32.vlgmr.msra.gmra.mrb[0].mxu1 %vm746_vm1, %v2524_v37 }
 0x167   : > { %2161 = vmatprep.mubr.msk.f32.mxu1 %vm2337_vm2, %v2336_v38 }
 0x239   : > { %v2158_v40 = vpop.f32.mrb[0].mxu1 }
 0x23a   : > { %v819_v41 = vpop.f32.mrb[1].mxu1  ;;  %v2543_v43 = vadd.f32 %v2158_v40, %v2067_v39 }
 0x23b   : > { %v2539_v42 = vadd.f32 %v2067_v39, %v819_v41 }
 0x23d   : > { %1001 = vrot.lane.b32.xlu1 %v2539_v42, %s2338_s17  ;;  %830 = vrot.lane.b32.xlu0 %v2539_v42, %s2339_s18 }
 0x241   : > { %1175 = vrot.lane.b32.xlu1 %v2543_v43, %s2339_s18  ;;  %1003 = vrot.lane.b32.xlu0 %v2539_v42, %s2340_s20 }
 0x245   : > { %1344 = vrot.lane.b32.xlu1 %v2543_v43, %s2338_s17  ;;  %1346 = vrot.lane.b32.xlu0 %v2543_v43, %s2340_s20  ;;  %s2343_s17 = smov 16  }
 0x2af   : > { %v831_v44 = vpop.permute.xlu0 %830  ;;  %v1002_v45 = vpop.permute.xlu1 %1001 }
 0x2b0   : > { %2160 = vmatpush3.xpose.msk.msra.mxu1 %vm832_vm3, %v831_v44 }
 0x2b1   : > { %2164 = vmatprep.subr.mxu1 %v2336_v38 }
 0x2b3   : > { %2162 = vmatmul.mubr.msk.f32.vlgmr.msra.gmra.mrb[2].mxu1 %vm832_vm3, %v2539_v42  ;;  %v1004_v46 = vpop.permute.xlu0 %1003  ;;  %v1176_v47 = vpop.permute.xlu1 %1175 }
 0x2b4   : > { %2170 = vmatpush3.xpose.msk.msra.mxu0 %vm832_vm3, %v1004_v46  ;;  %2166 = vmatprep.mubr.msk.f32.mxu1 %vm2337_vm2, %v2336_v38 }
 0x2b5   : > { %2179 = vmatprep.subr.mxu0 %v2336_v38 }
 0x2b7   : > { %2172 = vmatmul.mubr.msk.f32.vlgmr.msra.gmra.mrb[0].mxu0 %vm832_vm3, %v1002_v45  ;;  %v1347_v48 = vpop.permute.xlu0 %1346  ;;  %v1345_v49 = vpop.permute.xlu1 %1344 }
 0x2b8   : > { %2180 = vmatpush3.xpose.msk.msra.mxu0 %vm832_vm3, %v1176_v47  ;;  %2181 = vmatprep.mubr.msk.f32.mxu0 %vm2337_vm2, %v2336_v38  ;;  %v1516_v47 = vld [vmem:[%s2718_s0] sm:$0xff] }
 0x2b9   : > { %2189 = vmatprep.subr.mxu0 %v2336_v38 }
 0x2bb   : > { %2182 = vmatmul.mubr.msk.f32.vlgmr.msra.gmra.mrb[2].mxu0 %vm832_vm3, %v2543_v43 }
 0x2bc   : > { %2190 = vmatpush3.xpose.msk.msra.mxu0 %vm832_vm3, %v1347_v48  ;;  %2191 = vmatprep.mubr.msk.f32.mxu0 %vm2337_vm2, %v2336_v38  ;;  %v1517_v48 = vld [vmem:[%s2718_s0 + $0x8] sm:$0xff] }
 0x2bf   : > { %2192 = vmatmul.mubr.msk.f32.vlgmr.msra.gmra.mrb[4].mxu0 %vm832_vm3, %v1345_v49  ;;  %v2248_v49 = vpack.c.bf16 %v1517_v48, %v1516_v47  ;;  %v1769_v48 = vld [vmem:[%s2483_s21 + $0x20] sm:$0xff] }
 0x2c1   : > { %2249 = vmatprep.subr.bf16.mxu0 %v2248_v49 }
 0x2c2   : > { %2251 = vmatpush3.bf16.msra.mxu0 %v2248_v49  ;;  %v1770_v49 = vld [vmem:[%s2483_s21 + $0x28] sm:$0xff] }
 0x386   : > { %v903_v50 = vpop.f32.mrb[2].mxu1 }
 0x387   : > { %v907_v52 = vmul.f32 0.25, %v903_v50  ;;  %v2163_v53 = vpop.f32.mrb[3].mxu1  ;;  %v1518_v50 = vld [vmem:[%s2718_s0 + $0x10] sm:$0xff] }
 0x389   : > { %v912_v54 = vadd.f32 %v2072_v51, %v907_v52 }
 0x38a   : > { %v1075_v55 = vpop.f32.mrb[0].mxu0 }
 0x38b   : > { %v1079_v56 = vmul.f32 0.25, %v1075_v55  ;;  %v2173_v57 = vpop.f32.mrb[1].mxu0  ;;  %v914_v58 = vsel %vm913_vm4, %v912_v54, -inf }
 0x38c   : > { %915 = vmax.xlane.f32.xlu0 %v914_v58 }
 0x38d   : > { %v1080_v59 = vadd.f32 %v2072_v51, %v1079_v56  ;;  %v1519_v51 = vld [vmem:[%s2718_s0 + $0x18] sm:$0xff] }
 0x38e   : > { %v1247_v60 = vpop.f32.mrb[2].mxu0  ;;  %v2252_v52 = vpack.c.bf16 %v1519_v51, %v1518_v50  ;;  %v2272_v50 = vpack.c.bf16 %v1770_v49, %v1769_v48  ;;  %v1771_v51 = vld [vmem:[%s2483_s21 + $0x30] sm:$0xff] }
 0x38f   : > { %v1251_v62 = vmul.f32 0.25, %v1247_v60  ;;  %v2183_v63 = vpop.f32.mrb[3].mxu0  ;;  %v1081_v0 = vsel %vm913_vm4, %v1080_v59, -inf }
 0x390   : > { %1082 = vmax.xlane.f32.xlu1 %v1081_v0  ;;  %2253 = vmatprep.subr.bf16.mxu0 %v2252_v52  ;;  %v2084_v0 = vld [vmem:[%s2719_s27] ss:$0 sm:$0xff] }
 0x391   : > { %v1256_v1 = vadd.f32 %v2079_v61, %v1251_v62  ;;  %2255 = vmatpush3.bf16.msra.mxu0 %v2252_v52  ;;  %v1772_v52 = vld [vmem:[%s2483_s21 + $0x38] sm:$0xff] }
 0x392   : > { %v1418_v2 = vpop.f32.mrb[4].mxu0 }
 0x393   : > { %v1422_v3 = vmul.f32 0.25, %v1418_v2  ;;  %v2193_v4 = vpop.f32.mrb[5].mxu0  ;;  %v1257_v5 = vsel %vm913_vm4, %v1256_v1, -inf }
 0x394   : > { %1258 = vmax.xlane.f32.xlu0 %v1257_v5 }
 0x395   : > { %v1423_v6 = vadd.f32 %v2079_v61, %v1422_v3 }
 0x397   : > { %v1424_v7 = vsel %vm913_vm4, %v1423_v6, -inf }
 0x398   : > { %1425 = vmax.xlane.f32.xlu0 %v1424_v7 }
 0x3a1   : > { %925 = vrot.lane.b32.xlu1 %v2539_v42, %s2341_s30 }
 0x419   : > { %v916_v8 = vpop.xlane.xlu0 %915 }
 0x41a   : > { %v917_v9 = vsub.f32 %v912_v54, %v916_v8 }
 0x41c   : > { %v918_v10 = vmul.f32 1.442695, %v917_v9 }
 0x41d   : > { %v1083_v11 = vpop.xlane.xlu1 %1082 }
 0x41e   : > { %2300 = vpow2.f32 %v918_v10  ;;  %v1084_v12 = vsub.f32 %v1080_v59, %v1083_v11 }
 0x420   : > { %v1085_v13 = vmul.f32 1.442695, %v1084_v12 }
 0x421   : > { %v926_v14 = vpop.permute.xlu1 %925  ;;  %v1259_v15 = vpop.xlane.xlu0 %1258 }
 0x422   : > { %2302 = vpow2.f32 %v1085_v13  ;;  %v1260_v16 = vsub.f32 %v1256_v1, %v1259_v15  ;;  %2165 = vmatpush3.msra.mxu1 %v926_v14 }
 0x423   : > { %2174 = vmatprep.subr.mxu1 %v2336_v38 }
 0x424   : > { %v1261_v17 = vmul.f32 1.442695, %v1260_v16 }
 0x425   : > { %v1426_v18 = vpop.xlane.xlu0 %1425 }
 0x426   : > { %2304 = vpow2.f32 %v1261_v17  ;;  %v1427_v19 = vsub.f32 %v1423_v6, %v1426_v18  ;;  %v1655_v17 = vld [vmem:[%s2473_s4] sm:$0xff]  ;;  %v1656_v18 = vld [vmem:[%s2473_s4 + $0x8] sm:$0xff] }
 0x428   : > { %v2301_v20 = vpop.eup %2300  ;;  %v1428_v21 = vmul.f32 1.442695, %v1427_v19  ;;  %v2256_v19 = vpack.c.bf16 %v1656_v18, %v1655_v17 }
 0x429   : > { %v920_v22 = vsel %vm913_vm4, %v2301_v20, 0.0 }
 0x42a   : > { %2306 = vpow2.f32 %v1428_v21  ;;  %921 = vadd.xlane.f32.xlu1 %v920_v22  ;;  %v1658_v21 = vld [vmem:[%s2473_s4 + $0x18] sm:$0xff] }
 0x42c   : > { %v2303_v23 = vpop.eup %2302 }
 0x42d   : > { %v1087_v24 = vsel %vm913_vm4, %v2303_v23, 0.0 }
 0x42e   : > { %1088 = vadd.xlane.f32.xlu0 %v1087_v24 }
 0x430   : > { %v2305_v25 = vpop.eup %2304 }
 0x431   : > { %v1263_v26 = vsel %vm913_vm4, %v2305_v25, 0.0 }
 0x432   : > { %1264 = vadd.xlane.f32.xlu1 %v1263_v26 }
 0x434   : > { %v2307_v27 = vpop.eup %2306 }
 0x435   : > { %v1430_v28 = vsel %vm913_vm4, %v2307_v27, 0.0 }
 0x436   : > { %1431 = vadd.xlane.f32.xlu0 %v1430_v28 }
 0x443   : > { %1268 = vrot.lane.b32.xlu1 %v2543_v43, %s2341_s30 }
 0x447   : > { %1435 = vrot.lane.b32.xlu1 %v2543_v43, %s2342_s29 }
 0x44c   : > { %1092 = vrot.lane.b32.xlu0 %v2539_v42, %s2342_s29  ;;  %s2721_s29 = scalar_lea.vmem %s2691_s9, %s2441_s23 }
 0x4b7   : > { %v922_v29 = vpop.xlane.xlu1 %921 }
 0x4b8   : > { %2308 = vrcp.f32 %v922_v29 }
 0x4bb   : > { %v1089_v30 = vpop.xlane.xlu0 %1088 }
 0x4bc   : > { %2310 = vrcp.f32 %v1089_v30  ;;  %v2087_v30 = vld [vmem:[%s2720_s24] ss:$0 sm:$0xff] }
 0x4bf   : > { %v1265_v31 = vpop.xlane.xlu1 %1264 }
 0x4c0   : > { %2312 = vrcp.f32 %v1265_v31 }
 0x4c2   : > { %v2309_v32 = vpop.eup %2308 }
 0x4c3   : > { %v924_v33 = vmul.f32 %v2309_v32, %v2301_v20  ;;  %v1432_v34 = vpop.xlane.xlu0 %1431  ;;  %v1269_v40 = vpop.permute.xlu1 %1268  ;;  %v1657_v20 = vld [vmem:[%s2473_s4 + $0x10] sm:$0xff]  ;;  %v2088_v32 = vld [vmem:[%s2721_s29] ss:$0 sm:$0xff] }
 0x4c4   : > { %2314 = vrcp.f32 %v1432_v34  ;;  %v2260_v22 = vpack.c.bf16 %v1658_v21, %v1657_v20 }
 0x4c5   : > { %2167 = vmatmul.mubr.msk.f32.vlgmr.msra.gmra.mrb[4].mxu1 %vm913_vm4, %v924_v33 }
 0x4c6   : > { %v2311_v36 = vpop.eup %2310  ;;  %2176 = vmatprep.mubr.msk.f32.mxu1 %vm2337_vm2, %v2336_v38 }
 0x4c7   : > { %v1091_v39 = vmul.f32 %v2311_v36, %v2303_v23  ;;  %v1093_v41 = vpop.permute.xlu0 %1092  ;;  %v1436_v44 = vpop.permute.xlu1 %1435 }
 0x4c8   : > { %2175 = vmatpush3.msra.mxu1 %v1093_v41 }
 0x4c9   : > { %2177 = vmatmul.mubr.msk.f32.vlgmr.msra.gmra.mrb[6].mxu1 %vm913_vm4, %v1091_v39  ;;  %2184 = vmatprep.subr.mxu1 %v2336_v38 }
 0x4ca   : > { %v2313_v42 = vpop.eup %2312  ;;  %2185 = vmatpush3.msra.mxu1 %v1269_v40  ;;  %2186 = vmatprep.mubr.msk.f32.mxu1 %vm2337_vm2, %v2336_v38 }
 0x4cb   : > { %v1267_v43 = vmul.f32 %v2313_v42, %v2305_v25  ;;  %2194 = vmatprep.subr.mxu1 %v2336_v38  ;;  %v1765_v42 = vld [vmem:[%s2483_s21] sm:$0xff] }
 0x4cd   : > { %2187 = vmatmul.mubr.msk.f32.vlgmr.msra.gmra.mrb[8].mxu1 %vm913_vm4, %v1267_v43  ;;  %v1766_v43 = vld [vmem:[%s2483_s21 + $0x8] sm:$0xff] }
 0x4ce   : > { %v2315_v45 = vpop.eup %2314  ;;  %2195 = vmatpush3.msra.mxu1 %v1436_v44  ;;  %2196 = vmatprep.mubr.msk.f32.mxu1 %vm2337_vm2, %v2336_v38  ;;  %v2264_v44 = vpack.c.bf16 %v1766_v43, %v1765_v42  ;;  %v2096_v42 = vld [vmem:[%s678_s3] ss:$0 sm:$0xff] }
 0x4cf   : > { %v1434_v46 = vmul.f32 %v2315_v45, %v2307_v27  ;;  %2257 = vmatprep.subr.bf16.mxu1 %v2256_v19  ;;  %v1767_v45 = vld [vmem:[%s2483_s21 + $0x10] sm:$0xff] }
 0x4d0   : > { %2265 = vmatprep.subr.bf16.mxu0 %v2264_v44 }
 0x4d1   : > { %2197 = vmatmul.mubr.msk.f32.vlgmr.msra.gmra.mrb[10].mxu1 %vm913_vm4, %v1434_v46  ;;  %v1768_v46 = vld [vmem:[%s2483_s21 + $0x18] sm:$0xff] }
 0x4d2   : > { %2259 = vmatpush3.bf16.msra.mxu1 %v2256_v19  ;;  %v2268_v47 = vpack.c.bf16 %v1768_v46, %v1767_v45 }
 0x4d3   : > { %2261 = vmatprep.subr.bf16.mxu1 %v2260_v22 }
 0x4d6   : > { %2263 = vmatpush3.bf16.msra.mxu1 %v2260_v22 }
 0x598   : > { %v997_v53 = vpop.f32.mrb[4].mxu1 }
 0x599   : > { %v2168_v54 = vpop.f32.mrb[5].mxu1 }
 0x59a   : > { %v2089_v54 = vld [vmem:[%s664_s6] ss:$0 sm:$0xff] }
 0x59c   : > { %v1164_v55 = vpop.f32.mrb[6].mxu1 }
 0x59d   : > { %1169 = vrot.lane.b32.xlu0 %v1164_v55, %s2343_s17  ;;  %v2178_v38 = vpop.f32.mrb[7].mxu1 }
 0x5a0   : > { %v1340_v56 = vpop.f32.mrb[8].mxu1 }
 0x5a1   : > { %v2188_v57 = vpop.f32.mrb[9].mxu1 }
 0x5a4   : > { %v1507_v58 = vpop.f32.mrb[10].mxu1 }
 0x5a5   : > { %1512 = vrot.lane.b32.xlu1 %v1507_v58, %s2343_s17  ;;  %v2198_v59 = vpop.f32.mrb[11].mxu1 }
 0x60f   : > { %v1170_v60 = vpop.permute.xlu0 %1169 }
 0x610   : > { %v1172_v61 = vsel %vm832_vm3, %v997_v53, %v1170_v60  ;;  %v2276_v53 = vpack.c.bf16 %v1772_v52, %v1771_v51 }
 0x611   : > { %2207 = vmatprep.mubr.msk.f32.mxu0 %vm746_vm1, %v1172_v61 }
 0x617   : > { %v1513_v62 = vpop.permute.xlu1 %1512 }
 0x618   : > { %v1515_v63 = vsel %vm832_vm3, %v1340_v56, %v1513_v62 }
 0x619   : > { %2208 = vmatmul.mubr.msk.f32.vlgmr.msra.gmra.mrb[6].mxu0 %vm746_vm1, %v1515_v63 }
 0x61a   : > { %2267 = vmatpush3.bf16.msra.mxu0 %v2264_v44 }
 0x61b   : > { %2269 = vmatprep.subr.bf16.mxu0 %v2268_v47 }
 0x61e   : > { %2271 = vmatpush3.bf16.msra.mxu0 %v2268_v47 }
 0x61f   : > { %2273 = vmatprep.subr.bf16.mxu0 %v2272_v50 }
 0x622   : > { %2275 = vmatpush3.bf16.msra.mxu0 %v2272_v50 }
 0x623   : > { %2277 = vmatprep.subr.bf16.mxu0 %v2276_v53 }
 0x626   : > { %2279 = vmatpush3.bf16.msra.mxu0 %v2276_v53 }
 0x6ec   : > { %v2209_v1 = vpop.f32.mrb[6].mxu0 }
 0x6ed   : > { %v1605_v2 = vadd.f32 %v2209_v1, %v2084_v0  ;;  %v1599_v3 = vpop.f32.mrb[7].mxu0 }
 0x6ee   : > { %v1600_v4 = vadd.f32 %v2084_v0, %v1599_v3 }
 0x6ef   : > { %v1609_v5 = vadd.f32 %v1605_v2, %v2524_v37 }
 0x6f0   : > { %v1608_v6 = vadd.f32 %v1600_v4, %v2520_v35 }
 0x6f1   : > { %v1615_v7 = vsel %vm746_vm1, %v1609_v5, 0.0 }
 0x6f2   : > { %1616 = vadd.xlane.f32.xlu1 %v1615_v7  ;;  %v1612_v8 = vsel %vm746_vm1, %v1608_v6, 0.0 }
 0x6f3   : > { %1613 = vadd.xlane.f32.xlu0 %v1612_v8 }
 0x77f   : > { %v1617_v9 = vpop.xlane.xlu1 %1616 }
 0x780   : > { %v1620_v10 = vmul.f32 0.03125, %v1617_v9  ;;  %v1614_v11 = vpop.xlane.xlu0 %1613 }
 0x781   : > { %v1619_v12 = vmul.f32 0.03125, %v1614_v11 }
 0x782   : > { %v1622_v13 = vsub.f32 %v1609_v5, %v1620_v10 }
 0x783   : > { %v1621_v14 = vsub.f32 %v1608_v6, %v1619_v12  ;;  %v2092_v12 = vld [vmem:[%s672_s25] ss:$0 sm:$0xff] }
 0x784   : > { %v1624_v35 = vmul.f32 %v1622_v13, %v1622_v13 }
 0x785   : > { %v1623_v15 = vmul.f32 %v1621_v14, %v1621_v14 }
 0x786   : > { %v1628_v16 = vsel %vm746_vm1, %v1624_v35, 0.0 }
 0x787   : > { %v1625_v37 = vsel %vm746_vm1, %v1623_v15, 0.0 }
 0x788   : > { %1626 = vadd.xlane.f32.xlu0 %v1625_v37 }
 0x78c   : > { %1629 = vadd.xlane.f32.xlu0 %v1628_v16 }
 0x815   : > { %v1627_v23 = vpop.xlane.xlu0 %1626 }
 0x816   : > { %v1631_v24 = vmul.f32 0.03125, %v1627_v23 }
 0x818   : > { %v1633_v25 = vadd.f32 1e-05, %v1631_v24 }
 0x819   : > { %v1630_v26 = vpop.xlane.xlu0 %1629 }
 0x81a   : > { %2316 = vrsqrt.f32 %v1633_v25  ;;  %v1632_v27 = vmul.f32 0.03125, %v1630_v26 }
 0x81c   : > { %v1634_v28 = vadd.f32 1e-05, %v1632_v27 }
 0x81e   : > { %2318 = vrsqrt.f32 %v1634_v28 }
 0x824   : > { %v2317_v29 = vpop.eup %2316 }
 0x825   : > { %v1637_v31 = vmul.f32 %v2317_v29, %v1621_v14 }
 0x827   : > { %v1645_v33 = vmul.f32 %v2087_v30, %v1637_v31 }
 0x828   : > { %v2319_v34 = vpop.eup %2318 }
 0x829   : > { %v1638_v36 = vmul.f32 %v2319_v34, %v1622_v13  ;;  %v1653_v39 = vadd.f32 %v2088_v32, %v1645_v33 }
 0x82b   : > { %v1646_v40 = vmul.f32 %v2087_v30, %v1638_v36  ;;  %2218 = vmatprep.mubr.msk.f32.mxu1 %vm746_vm1, %v1653_v39 }
 0x82d   : > { %v1654_v41 = vadd.f32 %v2088_v32, %v1646_v40 }
 0x82f   : > { %2219 = vmatmul.mubr.msk.f32.vlgmr.msra.gmra.mrb[12].mxu1 %vm746_vm1, %v1654_v41 }
 0x902   : > { %v2220_v55 = vpop.f32.mrb[12].mxu1 }
 0x903   : > { %v1744_v38 = vadd.f32 %v2220_v55, %v2089_v54  ;;  %v1738_v56 = vpop.f32.mrb[13].mxu1 }
 0x904   : > { %v1739_v57 = vadd.f32 %v2089_v54, %v1738_v56 }
 0x905   : > { %v1750_v58 = vmul.f32 0.044715, %v1744_v38  ;;  %v1748_v9 = vmul.f32 0.5, %v1744_v38 }
 0x906   : > { %v1749_v59 = vmul.f32 0.044715, %v1739_v57  ;;  %v1747_v7 = vmul.f32 0.5, %v1739_v57 }
 0x907   : > { %v1752_v60 = vmul.f32 %v1750_v58, %v1744_v38 }
 0x908   : > { %v1751_v61 = vmul.f32 %v1749_v59, %v1739_v57 }
 0x909   : > { %v1754_v62 = vmul.f32 %v1752_v60, %v1744_v38 }
 0x90a   : > { %v1753_v63 = vmul.f32 %v1751_v61, %v1739_v57 }
 0x90b   : > { %v1756_v0 = vadd.f32 %v1754_v62, %v1744_v38 }
 0x90c   : > { %v1755_v1 = vadd.f32 %v1753_v63, %v1739_v57 }
 0x90d   : > { %v1758_v2 = vmul.f32 0.7978846, %v1756_v0 }
 0x90e   : > { %v1757_v3 = vmul.f32 0.7978846, %v1755_v1 }
 0x90f   : > { %2320 = vtanh.f32 %v1758_v2 }
 0x910   : > { %2322 = vtanh.f32 %v1757_v3 }
 0x919   : > { %v2321_v4 = vpop.eup %2320 }
 0x91a   : > { %v2323_v5 = vpop.eup %2322  ;;  %v1762_v6 = vadd.f32 1.0, %v2321_v4 }
 0x91b   : > { %v1761_v8 = vadd.f32 1.0, %v2323_v5 }
 0x91c   : > { %v1764_v11 = vmul.f32 %v1762_v6, %v1748_v9 }
 0x91d   : > { %v1763_v10 = vmul.f32 %v1761_v8, %v1747_v7 }
 0x91f   : > { %2237 = vmatprep.mubr.msk.f32.mxu0 %vm1780_vm5, %v1763_v10 }
 0x920   : > { %2238 = vmatmul.mubr.msk.f32.vlgmr.msra.gmra.mrb[8].mxu0 %vm1780_vm5, %v1764_v11 }
 0x9f3   : > { %v2239_v13 = vpop.f32.mrb[8].mxu0 }
 0x9f4   : > { %v1859_v14 = vadd.f32 %v2239_v13, %v2092_v12  ;;  %v1853_v15 = vpop.f32.mrb[9].mxu0 }
 0x9f5   : > { %v1854_v37 = vadd.f32 %v2092_v12, %v1853_v15 }
 0x9f6   : > { %v1863_v35 = vadd.f32 %v1859_v14, %v1654_v41 }
 0x9f7   : > { %v1862_v16 = vadd.f32 %v1854_v37, %v1653_v39  ;;  %v2095_v39 = vld [vmem:[%s675_s28] ss:$0 sm:$0xff] }
 0x9f8   : > { %v1869_v17 = vsel %vm746_vm1, %v1863_v35, 0.0 }
 0x9f9   : > { %1870 = vadd.xlane.f32.xlu0 %v1869_v17  ;;  %v1866_v18 = vsel %vm746_vm1, %v1862_v16, 0.0 }
 0x9fa   : > { %1867 = vadd.xlane.f32.xlu1 %v1866_v18 }
 0xa86   : > { %v1871_v19 = vpop.xlane.xlu0 %1870 }
 0xa87   : > { %v1873_v20 = vmul.f32 0.03125, %v1871_v19  ;;  %v1868_v21 = vpop.xlane.xlu1 %1867 }
 0xa88   : > { %v1872_v22 = vmul.f32 0.03125, %v1868_v21 }
 0xa89   : > { %v1875_v23 = vsub.f32 %v1863_v35, %v1873_v20 }
 0xa8a   : > { %v1874_v24 = vsub.f32 %v1862_v16, %v1872_v22 }
 0xa8b   : > { %v1877_v25 = vmul.f32 %v1875_v23, %v1875_v23 }
 0xa8c   : > { %v1876_v26 = vmul.f32 %v1874_v24, %v1874_v24 }
 0xa8d   : > { %v1881_v27 = vsel %vm746_vm1, %v1877_v25, 0.0 }
 0xa8e   : > { %1882 = vadd.xlane.f32.xlu0 %v1881_v27  ;;  %v1878_v28 = vsel %vm746_vm1, %v1876_v26, 0.0 }
 0xa8f   : > { %1879 = vadd.xlane.f32.xlu1 %v1878_v28 }
 0xb1b   : > { %v1883_v29 = vpop.xlane.xlu0 %1882 }
 0xb1c   : > { %v1885_v30 = vmul.f32 0.03125, %v1883_v29  ;;  %v1880_v31 = vpop.xlane.xlu1 %1879 }
 0xb1d   : > { %v1884_v32 = vmul.f32 0.03125, %v1880_v31 }
 0xb1e   : > { %v1887_v33 = vadd.f32 1e-05, %v1885_v30 }
 0xb1f   : > { %v1886_v34 = vadd.f32 1e-05, %v1884_v32 }
 0xb20   : > { %2324 = vrsqrt.f32 %v1887_v33 }
 0xb21   : > { %2326 = vrsqrt.f32 %v1886_v34 }
 0xb2a   : > { %v2325_v36 = vpop.eup %2324 }
 0xb2b   : > { %v2327_v40 = vpop.eup %2326  ;;  %v1891_v41 = vmul.f32 %v2325_v36, %v1875_v23 }
 0xb2c   : > { %v1890_v43 = vmul.f32 %v2327_v40, %v1874_v24  ;;  %1913 = sbr.rel (%p2097_p5) target bundleno = 2867 (0xb33), region = 92 }
 0xb2d   : > { %v1899_v44 = vmul.f32 %v2095_v39, %v1891_v41 }
 0xb2e   : > { %v1898_v45 = vmul.f32 %v2095_v39, %v1890_v43 }
 0xb2f   : > { %v1907_v46 = vadd.f32 %v2096_v42, %v1899_v44 }
 0xb30   : > { %v1906_v47 = vadd.f32 %v2096_v42, %v1898_v45 }
 0xb31   : > { %1909 = vst.msk [vmem:[#allocation2 + $0x8] sm:$0xff] %vm746_vm1, %v1907_v46  ;;  %1915 = vst.msk [vmem:[%s2722_s26 + $0x8] sm:$0xff] (!%p2097_p5), %vm746_vm1, %v1907_v46 }
 0xb32   : > { %1908 = vst.msk [vmem:[#allocation2] sm:$0xff] %vm746_vm1, %v1906_v47  ;;  %1914 = vst.msk [vmem:[%s2722_s26] sm:$0xff] (!%p2097_p5), %vm746_vm1, %v1906_v47 }
 0xb33 PF: > { %s2723_s24 = sld [smem:[#allocation3_spill]] }
 0xb39   : > { %s26_s21 = sadd.s32 1, %s2723_s24  }
 0xb3a   : > { %p23_p6 = scmp.ge.s32.totalorder %s26_s21, 4  }
 0xb3c   :  { %25 = sbr.rel (!%p23_p6) target bundleno = 7 (0x7), region = 151 }

</bundles_post_ra>
